<compile_context>
chip_gen: v5e
topology: v5e:2x2
jax: 0.10.0
libtpu: 0.0.40
codegen_flags: <defaults>
</compile_context>

<pallas_src>
import jax
import jax.numpy as jnp
from jax.experimental import pallas as pl
from jax.experimental.pallas import tpu as pltpu

OBJ_NUM = 150                 # cfg.OBJ_NUM
NUM_CLASSES = OBJ_NUM + 1     # 151
C_PAD = 256                   # class axis padded to a lane-aligned width
EMBED_DIM = 200
FEAT_SIZE = 2048
BBOX_SIZE = 8
OVERLAP_SIZE = 6
BO_IN = BBOX_SIZE + OVERLAP_SIZE   # 14
RL_INPUT = 256
RL_HIDDEN = 256
QUARTER = RL_INPUT // 4       # 64


def _round_up(x, m):
    return ((x + m - 1) // m) * m


# ---------------------------------------------------------------------------
# Kernel A: feature preprocessing (softmax + embed + merged linears + MLP)
# ---------------------------------------------------------------------------
def _feat_kernel(obj_pred_ref, vfeat_ref, bo_ref, emb_we_ref, wf_ref, wbo_ref,
                 wsub_ref, wobj_ref, bsub_ref, bobj_ref, cooc_ref,
                 sub_out_ref, obj_out_ref, dist_out_ref, distc_out_ref):
    # Softmax over 256 padded classes (pad logits are -1e30 -> exactly 0 prob).
    logits = obj_pred_ref[...]                                   # (T, 256)
    m = jnp.max(logits, axis=-1, keepdims=True)
    e = jnp.exp(logits - m)
    sm = e / jnp.sum(e, axis=-1, keepdims=True)
    dist_out_ref[...] = sm                                       # (T, 256)
    # Pre-contract the class distribution with the (padded) co-occurrence
    # matrix at full row-tile width (much better MXU use than per-batch N=8).
    distc_out_ref[...] = jnp.dot(sm, cooc_ref[...],
                                 preferred_element_type=jnp.float32)

    # bf16 x bf16 -> f32 on the dominant HBM stream.
    f1 = jnp.dot(vfeat_ref[...], wf_ref[...],
                 preferred_element_type=jnp.float32)             # (T, 64)
    # embedding matmul folded: softmax @ (emb_w @ we)
    f2 = jnp.dot(sm, emb_we_ref[...],
                 preferred_element_type=jnp.float32)             # (T, 64)
    # bbox + overlap linears merged via block-diagonal weight.
    f34 = jnp.dot(bo_ref[...], wbo_ref[...],
                  preferred_element_type=jnp.float32)            # (T, 128)

    # sub/obj = f1 @ W[0:64] + f2 @ W[64:128] + f34 @ W[128:256] + eff_bias
    sub = (jnp.dot(f1, wsub_ref[0:QUARTER, :],
                   preferred_element_type=jnp.float32)
           + jnp.dot(f2, wsub_ref[QUARTER:2 * QUARTER, :],
                     preferred_element_type=jnp.float32)
           + jnp.dot(f34, wsub_ref[2 * QUARTER:RL_INPUT, :],
                     preferred_element_type=jnp.float32)
           + bsub_ref[...])
    obj = (jnp.dot(f1, wobj_ref[0:QUARTER, :],
                   preferred_element_type=jnp.float32)
           + jnp.dot(f2, wobj_ref[QUARTER:2 * QUARTER, :],
                     preferred_element_type=jnp.float32)
           + jnp.dot(f34, wobj_ref[2 * QUARTER:RL_INPUT, :],
                     preferred_element_type=jnp.float32)
           + bobj_ref[...])
    sub_out_ref[...] = jnp.maximum(sub, 0.0)
    obj_out_ref[...] = jnp.maximum(obj, 0.0)


# ---------------------------------------------------------------------------
# Kernel B: batched NxN pair scores (batch-tiled grid, "parallel")
# ---------------------------------------------------------------------------
def _pair_kernel(sub_ref, obj_ref, dist_ref, distc_ref, cs_ref,
                 wmul_ref, wsub_ref, wobj_ref, scal_ref, out_ref):
    # Hoist scalar reads once per grid step.
    w_ps = scal_ref[0]
    w_ss = scal_ref[1]
    w_os = scal_ref[2]
    bias = scal_ref[3]

    S = sub_ref[...]          # (Bt, N, H)  sub feature of box k (column)
    O = obj_ref[...]          # (Bt, N, H)  obj feature of box j (row)
    D = dist_ref[...]         # (Bt, N, C)  padded class distribution
    DC = distc_ref[...]       # (Bt, N, C)  D @ cooc  (precomputed in kernel A)
    cs = cs_ref[...]          # (1, C)      class_scores (padded)
    w_mul = wmul_ref[...]     # (1, H)
    w_sub = wsub_ref[...]     # (1, H)
    w_obj = wobj_ref[...]     # (1, H)

    # pair[b, j, k] = sum_c D[b, j, c] * (D @ C)[b, k, c]  ==  D C D^T
    pair = jnp.einsum('bjc,bkc->bjk', D, DC,
                      preferred_element_type=jnp.float32)          # (Bt, N, N)

    # (O*w_mul + w_sub) @ S^T == mul_term + sub_dot_row (w_sub folded in)
    base = jnp.einsum('bjh,bkh->bjk', O * w_mul + w_sub, S,
                      preferred_element_type=jnp.float32)          # (Bt, N, N)

    obj_col = jnp.sum(O * w_obj, axis=-1, keepdims=True)           # (Bt, N, 1)
    s = jnp.sum(D * cs, axis=-1)                                   # (Bt, N)

    logits = (base + obj_col + w_ps * pair
              + w_ss * s[:, None, :] + w_os * s[:, :, None] + bias)
    out_ref[...] = pair * jax.nn.sigmoid(logits)


# ---------------------------------------------------------------------------
# Wrapper: padding / weight folding (tiny XLA-side work) + pallas_calls
# ---------------------------------------------------------------------------
def linearized_context_forward(visual_feat, obj_predict, bbox_embed,
                               overlap_embed, params, batch_size, box_num):
    total = batch_size * box_num
    H, N = RL_HIDDEN, box_num

    # ---- row tiling for the feature kernel (pipelined, bounded VMEM) ----
    row_tile = 512 if total >= 512 else _round_up(total, 8)
    total_pad = _round_up(total, row_tile)

    # ---- class padding 151 -> 256 (pad classes get exactly zero weight) ----
    obj_pred_pad = jnp.full((total_pad, C_PAD), -1e30, jnp.float32)
    obj_pred_pad = obj_pred_pad.at[:total, :NUM_CLASSES].set(
        obj_predict.astype(jnp.float32))

    vfeat = jnp.zeros((total_pad, FEAT_SIZE), jnp.bfloat16)
    vfeat = vfeat.at[:total].set(visual_feat.astype(jnp.bfloat16))

    bo_in = jnp.zeros((total_pad, BO_IN), jnp.float32)
    bo_in = bo_in.at[:total, :BBOX_SIZE].set(bbox_embed)
    bo_in = bo_in.at[:total, BBOX_SIZE:].set(overlap_embed)

    # ---- fold / pad weights ----
    wf_bf16 = params["wf"].astype(jnp.bfloat16)
    emb_we = jnp.zeros((C_PAD, QUARTER), jnp.float32).at[:NUM_CLASSES].set(
        params["emb_w"] @ params["we"])
    w_bo = jnp.zeros((BO_IN, 2 * QUARTER), jnp.float32)
    w_bo = w_bo.at[:BBOX_SIZE, :QUARTER].set(params["wb"])
    w_bo = w_bo.at[BBOX_SIZE:, QUARTER:].set(params["wo"])
    b34 = jnp.concatenate([params["bb"], params["bo"]], axis=1)      # (1, 128)
    wsub_full, wobj_full = params["wsub"], params["wobj"]
    eff_bsub = (params["bf"] @ wsub_full[:QUARTER]
                + params["be"] @ wsub_full[QUARTER:2 * QUARTER]
                + b34 @ wsub_full[2 * QUARTER:] + params["bsub"])
    eff_bobj = (params["bf"] @ wobj_full[:QUARTER]
                + params["be"] @ wobj_full[QUARTER:2 * QUARTER]
                + b34 @ wobj_full[2 * QUARTER:] + params["bobj"])

    cooc_pad = jnp.zeros((C_PAD, C_PAD), jnp.float32).at[
        1:NUM_CLASSES, 1:NUM_CLASSES].set(params["cooc"])
    class_scores = cooc_pad.sum(axis=1).reshape(1, C_PAD)

    # ------------------------- Kernel A -------------------------
    sub_feat, obj_feat, dist, distc = pl.pallas_call(
        _feat_kernel,
        out_shape=(
            jax.ShapeDtypeStruct((total_pad, H), jnp.float32),
            jax.ShapeDtypeStruct((total_pad, H), jnp.float32),
            jax.ShapeDtypeStruct((total_pad, C_PAD), jnp.float32),
            jax.ShapeDtypeStruct((total_pad, C_PAD), jnp.float32),
        ),
        grid=(total_pad // row_tile,),
        in_specs=[
            pl.BlockSpec((row_tile, C_PAD), lambda i: (i, 0)),       # logits
            pl.BlockSpec((row_tile, FEAT_SIZE), lambda i: (i, 0)),   # vfeat bf16
            pl.BlockSpec((row_tile, BO_IN), lambda i: (i, 0)),       # bbox|ovlp
            pl.BlockSpec((C_PAD, QUARTER), lambda i: (0, 0)),        # emb_we
            pl.BlockSpec((FEAT_SIZE, QUARTER), lambda i: (0, 0)),    # wf bf16
            pl.BlockSpec((BO_IN, 2 * QUARTER), lambda i: (0, 0)),    # w_bo
            pl.BlockSpec((RL_INPUT, RL_HIDDEN), lambda i: (0, 0)),   # wsub
            pl.BlockSpec((RL_INPUT, RL_HIDDEN), lambda i: (0, 0)),   # wobj
            pl.BlockSpec((1, RL_HIDDEN), lambda i: (0, 0)),          # eff_bsub
            pl.BlockSpec((1, RL_HIDDEN), lambda i: (0, 0)),          # eff_bobj
            pl.BlockSpec((C_PAD, C_PAD), lambda i: (0, 0)),          # cooc_pad
        ],
        out_specs=(
            pl.BlockSpec((row_tile, RL_HIDDEN), lambda i: (i, 0)),
            pl.BlockSpec((row_tile, RL_HIDDEN), lambda i: (i, 0)),
            pl.BlockSpec((row_tile, C_PAD), lambda i: (i, 0)),
            pl.BlockSpec((row_tile, C_PAD), lambda i: (i, 0)),
        ),
        compiler_params=pltpu.CompilerParams(
            dimension_semantics=("parallel",),
            vmem_limit_bytes=32 * 1024 * 1024),
    )(obj_pred_pad, vfeat, bo_in, emb_we, wf_bf16, w_bo,
      wsub_full, wobj_full, eff_bsub, eff_bobj, cooc_pad)

    sub3 = sub_feat[:total].reshape(batch_size, N, H)
    obj3 = obj_feat[:total].reshape(batch_size, N, H)
    dist3 = dist[:total].reshape(batch_size, N, C_PAD)
    distc3 = distc[:total].reshape(batch_size, N, C_PAD)

    # ---- batch tiling for the pair kernel ----
    bt = min(batch_size, 8)
    batch_pad = _round_up(batch_size, bt)
    if batch_pad != batch_size:
        pad = ((0, batch_pad - batch_size), (0, 0), (0, 0))
        sub3 = jnp.pad(sub3, pad)
        obj3 = jnp.pad(obj3, pad)
        dist3 = jnp.pad(dist3, pad)
        distc3 = jnp.pad(distc3, pad)

    # ---- split rl_scores weight ----
    w = params["w_scores"].reshape(-1)
    w_mul = w[:H].reshape(1, H)
    w_sub = w[H:2 * H].reshape(1, H)
    w_obj = w[2 * H:3 * H].reshape(1, H)
    scalars = jnp.stack([w[3 * H], w[3 * H + 1], w[3 * H + 2],
                         params["b_scores"]]).astype(jnp.float32)

    # ------------------------- Kernel B -------------------------
    tree = pl.pallas_call(
        _pair_kernel,
        out_shape=jax.ShapeDtypeStruct((batch_pad, N, N), jnp.float32),
        grid=(batch_pad // bt,),
        in_specs=[
            pl.BlockSpec((bt, N, H), lambda i: (i, 0, 0)),
            pl.BlockSpec((bt, N, H), lambda i: (i, 0, 0)),
            pl.BlockSpec((bt, N, C_PAD), lambda i: (i, 0, 0)),
            pl.BlockSpec((bt, N, C_PAD), lambda i: (i, 0, 0)),
            pl.BlockSpec((1, C_PAD), lambda i: (0, 0)),
            pl.BlockSpec((1, H), lambda i: (0, 0)),
            pl.BlockSpec((1, H), lambda i: (0, 0)),
            pl.BlockSpec((1, H), lambda i: (0, 0)),
            pl.BlockSpec(memory_space=pltpu.MemorySpace.SMEM),
        ],
        out_specs=pl.BlockSpec((bt, N, N), lambda i: (i, 0, 0)),
        compiler_params=pltpu.CompilerParams(
            dimension_semantics=("parallel",)),
    )(sub3, obj3, dist3, distc3, class_scores, w_mul, w_sub, w_obj, scalars)
    return tree[:batch_size]


# ---------------------------------------------------------------------------
# Deterministic parameter init (mirrors the PyTorch __init__ distributions)
# ---------------------------------------------------------------------------
def init_params(key):
    ks = jax.random.split(key, 10)

    def normal(k, shape, std):
        return std * jax.random.normal(k, shape, jnp.float32)

    def xavier(k, fan_in, fan_out, shape):
        bound = float(jnp.sqrt(6.0 / (fan_in + fan_out)))
        return jax.random.uniform(k, shape, jnp.float32, -bound, bound)

    cooc = jax.random.uniform(ks[1], (OBJ_NUM, OBJ_NUM), jnp.float32)
    cooc = cooc / cooc.sum()

    return dict(
        emb_w=jax.random.normal(ks[0], (NUM_CLASSES, EMBED_DIM), jnp.float32),
        cooc=cooc,
        wf=normal(ks[2], (FEAT_SIZE, QUARTER), 0.001),
        bf=jnp.zeros((1, QUARTER), jnp.float32),
        we=normal(ks[3], (EMBED_DIM, QUARTER), 0.01),
        be=jnp.zeros((1, QUARTER), jnp.float32),
        wb=normal(ks[4], (BBOX_SIZE, QUARTER), 1.0),
        bb=jnp.zeros((1, QUARTER), jnp.float32),
        wo=normal(ks[5], (OVERLAP_SIZE, QUARTER), 1.0),
        bo=jnp.zeros((1, QUARTER), jnp.float32),
        wsub=xavier(ks[6], RL_INPUT, RL_HIDDEN, (RL_INPUT, RL_HIDDEN)),
        bsub=jnp.zeros((1, RL_HIDDEN), jnp.float32),
        wobj=xavier(ks[7], RL_INPUT, RL_HIDDEN, (RL_INPUT, RL_HIDDEN)),
        bobj=jnp.zeros((1, RL_HIDDEN), jnp.float32),
        w_scores=xavier(ks[8], 3 * RL_HIDDEN + 3, 1, (3 * RL_HIDDEN + 3,)),
        b_scores=jnp.float32(0.0),
    )


# ---------------------------------------------------------------------------
# Pure-JAX reference mirroring the PyTorch forward (for correctness check)
# ---------------------------------------------------------------------------
def reference_forward(visual_feat, obj_predict, bbox_embed, overlap_embed,
                      params, batch_size, box_num):
    N, C, H = box_num, OBJ_NUM, RL_HIDDEN
    sm = jax.nn.softmax(obj_predict, axis=1)
    obj_embed = sm @ params["emb_w"]
    obj_distrib = sm[:, 1:].reshape(batch_size, N, C)
    class_scores = params["cooc"].sum(axis=1)
    prepro = jnp.concatenate([
        visual_feat @ params["wf"] + params["bf"],
        obj_embed @ params["we"] + params["be"],
        bbox_embed @ params["wb"] + params["bb"],
        overlap_embed @ params["wo"] + params["bo"]], axis=1)
    sub = jax.nn.relu(prepro @ params["wsub"] + params["bsub"]).reshape(batch_size, N, H)
    obj = jax.nn.relu(prepro @ params["wobj"] + params["bobj"]).reshape(batch_size, N, H)
    W = params["w_scores"]
    outs = []
    for i in range(batch_size):
        S, O, D = sub[i], obj[i], obj_distrib[i]
        sub_feat = jnp.broadcast_to(S[None, :, :], (N, N, H))
        obj_feat = jnp.broadcast_to(O[:, None, :], (N, N, H))
        sub_d = jnp.broadcast_to(D[None, :, :], (N, N, C)).reshape(-1, C)
        obj_d = jnp.broadcast_to(D[:, None, :], (N, N, C)).reshape(-1, C)
        dot = sub_d[:, :, None] * obj_d[:, None, :]
        pscore = (dot * params["cooc"]).reshape(N * N, -1).sum(1).reshape(N, N, 1)
        sscore = (sub_d * class_scores).sum(1).reshape(N, N, 1)
        oscore = (obj_d * class_scores).sum(1).reshape(N, N, 1)
        pf = jnp.concatenate([sub_feat * obj_feat, sub_feat, obj_feat,
                              pscore, sscore, oscore], axis=2)
        logit = pf.reshape(-1, 3 * H + 3) @ W + params["b_scores"]
        gate = jax.nn.sigmoid(logit).reshape(-1)
        outs.append((pscore.reshape(-1) * gate).reshape(N, N))
    return jnp.stack(outs)


if __name__ == "__main__":
    key = jax.random.PRNGKey(0)
    pkey, dkey = jax.random.split(key)
    params = init_params(pkey)

    batch_size, box_num = 2, 8
    total = batch_size * box_num
    k1, k2, k3, k4 = jax.random.split(dkey, 4)
    visual_feat = jax.random.normal(k1, (total, FEAT_SIZE), jnp.float32)
    obj_predict = jax.random.normal(k2, (total, NUM_CLASSES), jnp.float32)
    bbox_embed = jax.random.normal(k3, (total, BBOX_SIZE), jnp.float32)
    overlap_embed = jax.random.normal(k4, (total, OVERLAP_SIZE), jnp.float32)

    out = linearized_context_forward(visual_feat, obj_predict, bbox_embed,
                                     overlap_embed, params, batch_size, box_num)
    out = jax.block_until_ready(out)

    ref = reference_forward(visual_feat, obj_predict, bbox_embed,
                            overlap_embed, params, batch_size, box_num)
    assert out.shape == (batch_size, box_num, box_num)
    assert jnp.allclose(out, ref, rtol=2e-3, atol=1e-6), \
        float(jnp.max(jnp.abs(out - ref)))
    print("KERNEL_OK")
</pallas_src>

<mosaic_0001>
module attributes {stable_mosaic.version = 11 : i64} {
  func.func @_feat_kernel(%arg0: i32, %arg1: memref<16x256xf32, #tpu.memory_space<vmem>>, %arg2: memref<16x2048xbf16, #tpu.memory_space<vmem>>, %arg3: memref<16x14xf32, #tpu.memory_space<vmem>>, %arg4: memref<256x64xf32, #tpu.memory_space<vmem>>, %arg5: memref<2048x64xbf16, #tpu.memory_space<vmem>>, %arg6: memref<14x128xf32, #tpu.memory_space<vmem>>, %arg7: memref<256x256xf32, #tpu.memory_space<vmem>>, %arg8: memref<256x256xf32, #tpu.memory_space<vmem>>, %arg9: memref<1x256xf32, #tpu.memory_space<vmem>>, %arg10: memref<1x256xf32, #tpu.memory_space<vmem>>, %arg11: memref<256x256xf32, #tpu.memory_space<vmem>>, %arg12: memref<16x256xf32, #tpu.memory_space<vmem>>, %arg13: memref<16x256xf32, #tpu.memory_space<vmem>>, %arg14: memref<16x256xf32, #tpu.memory_space<vmem>>, %arg15: memref<16x256xf32, #tpu.memory_space<vmem>>) attributes {dimension_semantics = [#tpu.dimension_semantics<parallel>], iteration_bounds = array<i64: 1>, scalar_prefetch = 0 : i64, scratch_operands = 0 : i64, tpu.core_type = #tpu.core_type<tc>, window_params = [{transform_indices = @transform_0, window_bounds = array<i64: 16, 256>}, {transform_indices = @transform_1, window_bounds = array<i64: 16, 2048>}, {transform_indices = @transform_2, window_bounds = array<i64: 16, 14>}, {pipeline_mode = #tpu.pipeline_mode<synchronous>, transform_indices = @transform_3, window_bounds = array<i64: 256, 64>}, {pipeline_mode = #tpu.pipeline_mode<synchronous>, transform_indices = @transform_4, window_bounds = array<i64: 2048, 64>}, {pipeline_mode = #tpu.pipeline_mode<synchronous>, transform_indices = @transform_5, window_bounds = array<i64: 14, 128>}, {pipeline_mode = #tpu.pipeline_mode<synchronous>, transform_indices = @transform_6, window_bounds = array<i64: 256, 256>}, {pipeline_mode = #tpu.pipeline_mode<synchronous>, transform_indices = @transform_7, window_bounds = array<i64: 256, 256>}, {pipeline_mode = #tpu.pipeline_mode<synchronous>, transform_indices = @transform_8, window_bounds = array<i64: 1, 256>}, {pipeline_mode = #tpu.pipeline_mode<synchronous>, transform_indices = @transform_9, window_bounds = array<i64: 1, 256>}, {pipeline_mode = #tpu.pipeline_mode<synchronous>, transform_indices = @transform_10, window_bounds = array<i64: 256, 256>}, {transform_indices = @transform_11, window_bounds = array<i64: 16, 256>}, {transform_indices = @transform_12, window_bounds = array<i64: 16, 256>}, {transform_indices = @transform_13, window_bounds = array<i64: 16, 256>}, {transform_indices = @transform_14, window_bounds = array<i64: 16, 256>}]} {
    %c0 = arith.constant 0 : index
    %c0_0 = arith.constant 0 : index
    %0 = vector.load %arg1[%c0, %c0_0] : memref<16x256xf32, #tpu.memory_space<vmem>>, vector<16x256xf32>
    %cst = arith.constant dense<0xFF800000> : vector<16xf32>
    %1 = vector.multi_reduction <maximumf>, %0, %cst [1] : vector<16x256xf32> to vector<16xf32>
    %2 = vector.shape_cast %1 : vector<16xf32> to vector<16x1xf32>
    %3 = vector.broadcast %2 : vector<16x1xf32> to vector<16x256xf32>
    %4 = arith.subf %0, %3 : vector<16x256xf32>
    %5 = math.exp %4 : vector<16x256xf32>
    %cst_1 = arith.constant dense<0.000000e+00> : vector<16xf32>
    %6 = vector.multi_reduction <add>, %5, %cst_1 [1] : vector<16x256xf32> to vector<16xf32>
    %7 = vector.shape_cast %6 : vector<16xf32> to vector<16x1xf32>
    %8 = vector.broadcast %7 : vector<16x1xf32> to vector<16x256xf32>
    %9 = arith.divf %5, %8 : vector<16x256xf32>
    %c0_2 = arith.constant 0 : index
    %c0_3 = arith.constant 0 : index
    %10 = vector.load %arg14[%c0_2, %c0_3] : memref<16x256xf32, #tpu.memory_space<vmem>>, vector<16x256xf32>
    tpu.vector_store %arg14[%c0_2, %c0_3], %9 {strides = array<i32>} : memref<16x256xf32, #tpu.memory_space<vmem>>, vector<16x256xf32>,
    %c0_4 = arith.constant 0 : index
    %c0_5 = arith.constant 0 : index
    %11 = vector.load %arg11[%c0_4, %c0_5] : memref<256x256xf32, #tpu.memory_space<vmem>>, vector<256x256xf32>
    %cst_6 = arith.constant dense<0.000000e+00> : vector<16x256xf32>
    %12 = tpu.matmul %9, %11, %cst_6 {dimension_numbers = #tpu.dot_dimension_numbers<[1], [0], [0], [1], [0, 0, 1, 1], [], []>} : vector<16x256xf32>, vector<256x256xf32>, vector<16x256xf32> -> vector<16x256xf32>
    %c0_7 = arith.constant 0 : index
    %c0_8 = arith.constant 0 : index
    %13 = vector.load %arg15[%c0_7, %c0_8] : memref<16x256xf32, #tpu.memory_space<vmem>>, vector<16x256xf32>
    tpu.vector_store %arg15[%c0_7, %c0_8], %12 {strides = array<i32>} : memref<16x256xf32, #tpu.memory_space<vmem>>, vector<16x256xf32>,
    %c0_9 = arith.constant 0 : index
    %c0_10 = arith.constant 0 : index
    %14 = vector.load %arg2[%c0_9, %c0_10] : memref<16x2048xbf16, #tpu.memory_space<vmem>>, vector<16x2048xbf16>
    %c0_11 = arith.constant 0 : index
    %c0_12 = arith.constant 0 : index
    %15 = vector.load %arg5[%c0_11, %c0_12] : memref<2048x64xbf16, #tpu.memory_space<vmem>>, vector<2048x64xbf16>
    %cst_13 = arith.constant dense<0.000000e+00> : vector<16x64xf32>
    %16 = tpu.matmul %14, %15, %cst_13 {dimension_numbers = #tpu.dot_dimension_numbers<[1], [0], [0], [1], [0, 0, 1, 1], [], []>} : vector<16x2048xbf16>, vector<2048x64xbf16>, vector<16x64xf32> -> vector<16x64xf32>
    %c0_14 = arith.constant 0 : index
    %c0_15 = arith.constant 0 : index
    %17 = vector.load %arg4[%c0_14, %c0_15] : memref<256x64xf32, #tpu.memory_space<vmem>>, vector<256x64xf32>
    %cst_16 = arith.constant dense<0.000000e+00> : vector<16x64xf32>
    %18 = tpu.matmul %9, %17, %cst_16 {dimension_numbers = #tpu.dot_dimension_numbers<[1], [0], [0], [1], [0, 0, 1, 1], [], []>} : vector<16x256xf32>, vector<256x64xf32>, vector<16x64xf32> -> vector<16x64xf32>
    %c0_17 = arith.constant 0 : index
    %c0_18 = arith.constant 0 : index
    %19 = vector.load %arg3[%c0_17, %c0_18] : memref<16x14xf32, #tpu.memory_space<vmem>>, vector<16x14xf32>
    %c0_19 = arith.constant 0 : index
    %c0_20 = arith.constant 0 : index
    %20 = vector.load %arg6[%c0_19, %c0_20] : memref<14x128xf32, #tpu.memory_space<vmem>>, vector<14x128xf32>
    %cst_21 = arith.constant dense<0.000000e+00> : vector<16x128xf32>
    %21 = tpu.matmul %19, %20, %cst_21 {dimension_numbers = #tpu.dot_dimension_numbers<[1], [0], [0], [1], [0, 0, 1, 1], [], []>} : vector<16x14xf32>, vector<14x128xf32>, vector<16x128xf32> -> vector<16x128xf32>
    %c0_22 = arith.constant 0 : index
    %c0_23 = arith.constant 0 : index
    %22 = vector.load %arg7[%c0_22, %c0_23] : memref<256x256xf32, #tpu.memory_space<vmem>>, vector<64x256xf32>
    %cst_24 = arith.constant dense<0.000000e+00> : vector<16x256xf32>
    %23 = tpu.matmul %16, %22, %cst_24 {dimension_numbers = #tpu.dot_dimension_numbers<[1], [0], [0], [1], [0, 0, 1, 1], [], []>} : vector<16x64xf32>, vector<64x256xf32>, vector<16x256xf32> -> vector<16x256xf32>
    %c64 = arith.constant 64 : index
    %c0_25 = arith.constant 0 : index
    %24 = vector.load %arg7[%c64, %c0_25] : memref<256x256xf32, #tpu.memory_space<vmem>>, vector<64x256xf32>
    %cst_26 = arith.constant dense<0.000000e+00> : vector<16x256xf32>
    %25 = tpu.matmul %18, %24, %cst_26 {dimension_numbers = #tpu.dot_dimension_numbers<[1], [0], [0], [1], [0, 0, 1, 1], [], []>} : vector<16x64xf32>, vector<64x256xf32>, vector<16x256xf32> -> vector<16x256xf32>
    %26 = arith.addf %23, %25 : vector<16x256xf32>
    %c128 = arith.constant 128 : index
    %c0_27 = arith.constant 0 : index
    %27 = vector.load %arg7[%c128, %c0_27] : memref<256x256xf32, #tpu.memory_space<vmem>>, vector<128x256xf32>
    %cst_28 = arith.constant dense<0.000000e+00> : vector<16x256xf32>
    %28 = tpu.matmul %21, %27, %cst_28 {dimension_numbers = #tpu.dot_dimension_numbers<[1], [0], [0], [1], [0, 0, 1, 1], [], []>} : vector<16x128xf32>, vector<128x256xf32>, vector<16x256xf32> -> vector<16x256xf32>
    %29 = arith.addf %26, %28 : vector<16x256xf32>
    %c0_29 = arith.constant 0 : index
    %c0_30 = arith.constant 0 : index
    %30 = vector.load %arg9[%c0_29, %c0_30] : memref<1x256xf32, #tpu.memory_space<vmem>>, vector<1x256xf32>
    %31 = vector.broadcast %30 : vector<1x256xf32> to vector<16x256xf32>
    %32 = arith.addf %29, %31 : vector<16x256xf32>
    %c0_31 = arith.constant 0 : index
    %c0_32 = arith.constant 0 : index
    %33 = vector.load %arg8[%c0_31, %c0_32] : memref<256x256xf32, #tpu.memory_space<vmem>>, vector<64x256xf32>
    %cst_33 = arith.constant dense<0.000000e+00> : vector<16x256xf32>
    %34 = tpu.matmul %16, %33, %cst_33 {dimension_numbers = #tpu.dot_dimension_numbers<[1], [0], [0], [1], [0, 0, 1, 1], [], []>} : vector<16x64xf32>, vector<64x256xf32>, vector<16x256xf32> -> vector<16x256xf32>
    %c64_34 = arith.constant 64 : index
    %c0_35 = arith.constant 0 : index
    %35 = vector.load %arg8[%c64_34, %c0_35] : memref<256x256xf32, #tpu.memory_space<vmem>>, vector<64x256xf32>
    %cst_36 = arith.constant dense<0.000000e+00> : vector<16x256xf32>
    %36 = tpu.matmul %18, %35, %cst_36 {dimension_numbers = #tpu.dot_dimension_numbers<[1], [0], [0], [1], [0, 0, 1, 1], [], []>} : vector<16x64xf32>, vector<64x256xf32>, vector<16x256xf32> -> vector<16x256xf32>
    %37 = arith.addf %34, %36 : vector<16x256xf32>
    %c128_37 = arith.constant 128 : index
    %c0_38 = arith.constant 0 : index
    %38 = vector.load %arg8[%c128_37, %c0_38] : memref<256x256xf32, #tpu.memory_space<vmem>>, vector<128x256xf32>
    %cst_39 = arith.constant dense<0.000000e+00> : vector<16x256xf32>
    %39 = tpu.matmul %21, %38, %cst_39 {dimension_numbers = #tpu.dot_dimension_numbers<[1], [0], [0], [1], [0, 0, 1, 1], [], []>} : vector<16x128xf32>, vector<128x256xf32>, vector<16x256xf32> -> vector<16x256xf32>
    %40 = arith.addf %37, %39 : vector<16x256xf32>
    %c0_40 = arith.constant 0 : index
    %c0_41 = arith.constant 0 : index
    %41 = vector.load %arg10[%c0_40, %c0_41] : memref<1x256xf32, #tpu.memory_space<vmem>>, vector<1x256xf32>
    %42 = vector.broadcast %41 : vector<1x256xf32> to vector<16x256xf32>
    %43 = arith.addf %40, %42 : vector<16x256xf32>
    %cst_42 = arith.constant 0.000000e+00 : f32
    %44 = vector.broadcast %cst_42 : f32 to vector<16x256xf32>
    %45 = arith.maximumf %32, %44 : vector<16x256xf32>
    %c0_43 = arith.constant 0 : index
    %c0_44 = arith.constant 0 : index
    %46 = vector.load %arg12[%c0_43, %c0_44] : memref<16x256xf32, #tpu.memory_space<vmem>>, vector<16x256xf32>
    tpu.vector_store %arg12[%c0_43, %c0_44], %45 {strides = array<i32>} : memref<16x256xf32, #tpu.memory_space<vmem>>, vector<16x256xf32>,
    %cst_45 = arith.constant 0.000000e+00 : f32
    %47 = vector.broadcast %cst_45 : f32 to vector<16x256xf32>
    %48 = arith.maximumf %43, %47 : vector<16x256xf32>
    %c0_46 = arith.constant 0 : index
    %c0_47 = arith.constant 0 : index
    %49 = vector.load %arg13[%c0_46, %c0_47] : memref<16x256xf32, #tpu.memory_space<vmem>>, vector<16x256xf32>
    tpu.vector_store %arg13[%c0_46, %c0_47], %48 {strides = array<i32>} : memref<16x256xf32, #tpu.memory_space<vmem>>, vector<16x256xf32>,
    return
  }
  func.func @transform_0(%arg0: i32) -> (i32, i32) {
    %c0_i32 = arith.constant 0 : i32
    %c0_i32_0 = arith.constant 0 : i32
    return %arg0, %c0_i32 : i32, i32
  }
  func.func @transform_1(%arg0: i32) -> (i32, i32) {
    %c0_i32 = arith.constant 0 : i32
    %c0_i32_0 = arith.constant 0 : i32
    return %arg0, %c0_i32 : i32, i32
  }
  func.func @transform_2(%arg0: i32) -> (i32, i32) {
    %c0_i32 = arith.constant 0 : i32
    %c0_i32_0 = arith.constant 0 : i32
    return %arg0, %c0_i32 : i32, i32
  }
  func.func @transform_3(%arg0: i32) -> (i32, i32) {
    %c0_i32 = arith.constant 0 : i32
    %c0_i32_0 = arith.constant 0 : i32
    %c0_i32_1 = arith.constant 0 : i32
    return %c0_i32, %c0_i32_0 : i32, i32
  }
  func.func @transform_4(%arg0: i32) -> (i32, i32) {
    %c0_i32 = arith.constant 0 : i32
    %c0_i32_0 = arith.constant 0 : i32
    %c0_i32_1 = arith.constant 0 : i32
    return %c0_i32, %c0_i32_0 : i32, i32
  }
  func.func @transform_5(%arg0: i32) -> (i32, i32) {
    %c0_i32 = arith.constant 0 : i32
    %c0_i32_0 = arith.constant 0 : i32
    %c0_i32_1 = arith.constant 0 : i32
    return %c0_i32, %c0_i32_0 : i32, i32
  }
  func.func @transform_6(%arg0: i32) -> (i32, i32) {
    %c0_i32 = arith.constant 0 : i32
    %c0_i32_0 = arith.constant 0 : i32
    %c0_i32_1 = arith.constant 0 : i32
    return %c0_i32, %c0_i32_0 : i32, i32
  }
  func.func @transform_7(%arg0: i32) -> (i32, i32) {
    %c0_i32 = arith.constant 0 : i32
    %c0_i32_0 = arith.constant 0 : i32
    %c0_i32_1 = arith.constant 0 : i32
    return %c0_i32, %c0_i32_0 : i32, i32
  }
  func.func @transform_8(%arg0: i32) -> (i32, i32) {
    %c0_i32 = arith.constant 0 : i32
    %c0_i32_0 = arith.constant 0 : i32
    %c0_i32_1 = arith.constant 0 : i32
    return %c0_i32, %c0_i32_0 : i32, i32
  }
  func.func @transform_9(%arg0: i32) -> (i32, i32) {
    %c0_i32 = arith.constant 0 : i32
    %c0_i32_0 = arith.constant 0 : i32
    %c0_i32_1 = arith.constant 0 : i32
    return %c0_i32, %c0_i32_0 : i32, i32
  }
  func.func @transform_10(%arg0: i32) -> (i32, i32) {
    %c0_i32 = arith.constant 0 : i32
    %c0_i32_0 = arith.constant 0 : i32
    %c0_i32_1 = arith.constant 0 : i32
    return %c0_i32, %c0_i32_0 : i32, i32
  }
  func.func @transform_11(%arg0: i32) -> (i32, i32) {
    %c0_i32 = arith.constant 0 : i32
    %c0_i32_0 = arith.constant 0 : i32
    return %arg0, %c0_i32 : i32, i32
  }
  func.func @transform_12(%arg0: i32) -> (i32, i32) {
    %c0_i32 = arith.constant 0 : i32
    %c0_i32_0 = arith.constant 0 : i32
    return %arg0, %c0_i32 : i32, i32
  }
  func.func @transform_13(%arg0: i32) -> (i32, i32) {
    %c0_i32 = arith.constant 0 : i32
    %c0_i32_0 = arith.constant 0 : i32
    return %arg0, %c0_i32 : i32, i32
  }
  func.func @transform_14(%arg0: i32) -> (i32, i32) {
    %c0_i32 = arith.constant 0 : i32
    %c0_i32_0 = arith.constant 0 : i32
    return %arg0, %c0_i32 : i32, i32
  }
}

</mosaic_0001>

<bundles_post_ra>
// kernel: tpu_custom_call.1
= control target key start
LH: loop header
LB: loop body
LE: loop exit
PB: predicated region body
PF: predicated region fallthrough
CT: control target
= control target key end

     0   :  { %20 = vsyncpa [#allocation3], 0  ;;  %s4602_s0 = inlined_call_operand.vmem [shape: f32[16,256], index: 0, kind: input, shape index: {}]   ;;  %s4603_s1 = inlined_call_operand.vmem [shape: bf16[16,2048], index: 1, kind: input, shape index: {}]   ;;  %s4604_s2 = inlined_call_operand.vmem [shape: f32[16,14], index: 2, kind: input, shape index: {}]   ;;  %s4605_s3 = inlined_call_operand.vmem [shape: f32[256,64], index: 3, kind: input, shape index: {}]   ;;  %s4606_s4 = inlined_call_operand.vmem [shape: bf16[2048,64], index: 4, kind: input, shape index: {}]   ;;  %s4607_s5 = inlined_call_operand.vmem [shape: f32[14,128], index: 5, kind: input, shape index: {}]   ;;  %s4608_s6 = inlined_call_operand.vmem [shape: f32[256,256], index: 6, kind: input, shape index: {}]   ;;  %s4609_s7 = inlined_call_operand.vmem [shape: f32[256,256], index: 7, kind: input, shape index: {}]   ;;  %s4610_s8 = inlined_call_operand.vmem [shape: f32[1,256], index: 8, kind: input, shape index: {}]   ;;  %s4611_s9 = inlined_call_operand.vmem [shape: f32[1,256], index: 9, kind: input, shape index: {}]   ;;  %s4612_s10 = inlined_call_operand.vmem [shape: f32[256,256], index: 10, kind: input, shape index: {}]   ;;  %s4613_s11 = inlined_call_operand.hbm [shape: f32[16,256], index: 11, kind: output, shape index: {0}]   ;;  %s4614_s12 = inlined_call_operand.hbm [shape: f32[16,256], index: 12, kind: output, shape index: {1}]   ;;  %s4615_s13 = inlined_call_operand.hbm [shape: f32[16,256], index: 13, kind: output, shape index: {2}]   ;;  %s4616_s14 = inlined_call_operand.hbm [shape: f32[16,256], index: 14, kind: output, shape index: {3}]  }
   0x1   :  { %21 = vsyncpa [#allocation5], 0  ;;  %v45_v0 = vld [vmem:[%s4602_s0] sm:$0xff]  ;;  %v46_v1 = vld [vmem:[%s4602_s0 + $0x8] sm:$0xff] }
   0x2   :  { %v49_v2 = vmax.f32 %v45_v0, %v46_v1 }
   0x3   :  { %22 = vsyncpa [#allocation8], 0  ;;  %v3226_v3 = vld [vmem:[%s4602_s0 + $0x10] sm:$0xff]  ;;  %v3231_v4 = vld [vmem:[%s4602_s0 + $0x18] sm:$0xff]  ;;  %vm1702_vm8 = vcmask 1045504   ;;  %vm1695_vm9 = vcmask 113664  }
   0x4   :  { %50 = vmax.xlane.f32.xlu0 %v49_v2  ;;  %v52_v5 = vmax.f32 %v3226_v3, %v3231_v4  ;;  %v139_v6 = vld [vmem:[%s4612_s10 + $0xf0] sm:$0xff]  ;;  %v140_v8 = vld [vmem:[%s4612_s10 + $0xf8] sm:$0xff]  ;;  %v137_v9 = vld [vmem:[%s4612_s10 + $0xe0] sm:$0xff]  ;;  %vm1761_vm10 = vcmask 523264   ;;  %s3137_s17 = smov 256   ;;  %s3138_s18 = smov 16  }
   0x5   :  { %v171_v7 = vld [vmem:[%s4612_s10 + $0x1f0] sm:$0xff]  ;;  %173 = vmatpush.msra.mxu0 %v139_v6  ;;  %v169_v10 = vld [vmem:[%s4612_s10 + $0x1e0] sm:$0xff]  ;;  %v138_v11 = vld [vmem:[%s4612_s10 + $0xe8] sm:$0xff]  ;;  %219 = vmatpush.msra.mxu2 %v140_v8  ;;  %s2209_s26 = sshll.u32 %s4614_s12, 4  ;;  %s2210_s26 = int_to_ptr.hbm [resolvable:$true] %s2209_s26 }
   0x6   :  { %196 = vmatpush.msra.mxu1 %v171_v7  ;;  %v172_v12 = vld [vmem:[%s4612_s10 + $0x1f8] sm:$0xff]  ;;  %v135_v13 = vld [vmem:[%s4612_s10 + $0xd0] sm:$0xff]  ;;  %v170_v16 = vld [vmem:[%s4612_s10 + $0x1e8] sm:$0xff] }
   0x7   :  { %v167_v14 = vld [vmem:[%s4612_s10 + $0x1d0] sm:$0xff]  ;;  %174 = vmatpush.msra.mxu0 %v137_v9  ;;  %v136_v15 = vld [vmem:[%s4612_s10 + $0xd8] sm:$0xff]  ;;  %220 = vmatpush.msra.mxu2 %v138_v11  ;;  %v133_v17 = vld [vmem:[%s4612_s10 + $0xc0] sm:$0xff] }
   0x8   :  { %197 = vmatpush.msra.mxu1 %v169_v10  ;;  %242 = vmatpush.msra.mxu3 %v172_v12  ;;  %v165_v18 = vld [vmem:[%s4612_s10 + $0x1c0] sm:$0xff]  ;;  %v134_v19 = vld [vmem:[%s4612_s10 + $0xc8] sm:$0xff]  ;;  %v168_v20 = vld [vmem:[%s4612_s10 + $0x1d8] sm:$0xff] }
   0x9   :  { %175 = vmatpush.msra.mxu0 %v135_v13  ;;  %221 = vmatpush.msra.mxu2 %v136_v15  ;;  %v131_v21 = vld [vmem:[%s4612_s10 + $0xb0] sm:$0xff]  ;;  %v132_v23 = vld [vmem:[%s4612_s10 + $0xb8] sm:$0xff]  ;;  %v166_v24 = vld [vmem:[%s4612_s10 + $0x1c8] sm:$0xff] }
   0xa   :  { %198 = vmatpush.msra.mxu1 %v167_v14  ;;  %243 = vmatpush.msra.mxu3 %v170_v16  ;;  %v163_v22 = vld [vmem:[%s4612_s10 + $0x1b0] sm:$0xff]  ;;  %v129_v25 = vld [vmem:[%s4612_s10 + $0xa0] sm:$0xff]  ;;  %v130_v28 = vld [vmem:[%s4612_s10 + $0xa8] sm:$0xff] }
   0xb   :  { %176 = vmatpush.msra.mxu0 %v133_v17  ;;  %222 = vmatpush.msra.mxu2 %v134_v19  ;;  %v161_v26 = vld [vmem:[%s4612_s10 + $0x1a0] sm:$0xff]  ;;  %v164_v29 = vld [vmem:[%s4612_s10 + $0x1b8] sm:$0xff]  ;;  %v127_v32 = vld [vmem:[%s4612_s10 + $0x90] sm:$0xff] }
   0xc   :  { %53 = vmax.xlane.f32.xlu0 %v52_v5  ;;  %199 = vmatpush.msra.mxu1 %v165_v18  ;;  %v159_v33 = vld [vmem:[%s4612_s10 + $0x190] sm:$0xff]  ;;  %v128_v34 = vld [vmem:[%s4612_s10 + $0x98] sm:$0xff]  ;;  %v162_v35 = vld [vmem:[%s4612_s10 + $0x1a8] sm:$0xff] }
   0xd   :  { %244 = vmatpush.msra.mxu3 %v168_v20  ;;  %177 = vmatpush.msra.mxu0 %v131_v21  ;;  %v125_v38 = vld [vmem:[%s4612_s10 + $0x80] sm:$0xff]  ;;  %v126_v40 = vld [vmem:[%s4612_s10 + $0x88] sm:$0xff]  ;;  %v160_v41 = vld [vmem:[%s4612_s10 + $0x198] sm:$0xff] }
   0xe   :  { %200 = vmatpush.msra.mxu1 %v163_v22  ;;  %223 = vmatpush.msra.mxu2 %v132_v23  ;;  %v157_v39 = vld [vmem:[%s4612_s10 + $0x180] sm:$0xff]  ;;  %v123_v42 = vld [vmem:[%s4612_s10 + $0x70] sm:$0xff]  ;;  %v124_v44 = vld [vmem:[%s4612_s10 + $0x78] sm:$0xff] }
   0xf   :  { %245 = vmatpush.msra.mxu3 %v166_v24  ;;  %178 = vmatpush.msra.mxu0 %v129_v25  ;;  %v155_v43 = vld [vmem:[%s4612_s10 + $0x170] sm:$0xff]  ;;  %v158_v45 = vld [vmem:[%s4612_s10 + $0x188] sm:$0xff]  ;;  %v121_v46 = vld [vmem:[%s4612_s10 + $0x60] sm:$0xff] }
  0x10   :  { %201 = vmatpush.msra.mxu1 %v161_v26  ;;  %224 = vmatpush.msra.mxu2 %v130_v28  ;;  %v153_v47 = vld [vmem:[%s4612_s10 + $0x160] sm:$0xff]  ;;  %v122_v49 = vld [vmem:[%s4612_s10 + $0x68] sm:$0xff]  ;;  %v156_v50 = vld [vmem:[%s4612_s10 + $0x178] sm:$0xff] }
  0x11   :  { %246 = vmatpush.msra.mxu3 %v164_v29  ;;  %179 = vmatpush.msra.mxu0 %v127_v32  ;;  %v119_v53 = vld [vmem:[%s4612_s10 + $0x50] sm:$0xff]  ;;  %v120_v55 = vld [vmem:[%s4612_s10 + $0x58] sm:$0xff]  ;;  %v154_v56 = vld [vmem:[%s4612_s10 + $0x168] sm:$0xff] }
  0x12   :  { %202 = vmatpush.msra.mxu1 %v159_v33  ;;  %225 = vmatpush.msra.mxu2 %v128_v34  ;;  %v151_v54 = vld [vmem:[%s4612_s10 + $0x150] sm:$0xff]  ;;  %v117_v60 = vld [vmem:[%s4612_s10 + $0x40] sm:$0xff]  ;;  %v118_v63 = vld [vmem:[%s4612_s10 + $0x48] sm:$0xff] }
  0x13   :  { %247 = vmatpush.msra.mxu3 %v162_v35  ;;  %180 = vmatpush.msra.mxu0 %v125_v38  ;;  %v149_v61 = vld [vmem:[%s4612_s10 + $0x140] sm:$0xff]  ;;  %v115_v2 = vld [vmem:[%s4612_s10 + $0x30] sm:$0xff]  ;;  %v150_v5 = vld [vmem:[%s4612_s10 + $0x148] sm:$0xff] }
  0x14   :  { %203 = vmatpush.msra.mxu1 %v157_v39  ;;  %226 = vmatpush.msra.mxu2 %v126_v40  ;;  %v113_v6 = vld [vmem:[%s4612_s10 + $0x20] sm:$0xff]  ;;  %v114_v8 = vld [vmem:[%s4612_s10 + $0x28] sm:$0xff]  ;;  %v148_v9 = vld [vmem:[%s4612_s10 + $0x138] sm:$0xff] }
  0x15   :  { %248 = vmatpush.msra.mxu3 %v160_v41  ;;  %181 = vmatpush.msra.mxu0 %v123_v42  ;;  %v145_v7 = vld [vmem:[%s4612_s10 + $0x120] sm:$0xff]  ;;  %v111_v10 = vld [vmem:[%s4612_s10 + $0x10] sm:$0xff]  ;;  %v112_v12 = vld [vmem:[%s4612_s10 + $0x18] sm:$0xff] }
  0x16   :  { %204 = vmatpush.msra.mxu1 %v155_v43  ;;  %227 = vmatpush.msra.mxu2 %v124_v44  ;;  %v143_v11 = vld [vmem:[%s4612_s10 + $0x110] sm:$0xff]  ;;  %v146_v14 = vld [vmem:[%s4612_s10 + $0x128] sm:$0xff]  ;;  %v109_v15 = vld [vmem:[%s4612_s10] sm:$0xff] }
  0x17   :  { %249 = vmatpush.msra.mxu3 %v158_v45  ;;  %182 = vmatpush.msra.mxu0 %v121_v46  ;;  %v141_v17 = vld [vmem:[%s4612_s10 + $0x100] sm:$0xff]  ;;  %v110_v18 = vld [vmem:[%s4612_s10 + $0x8] sm:$0xff]  ;;  %v144_v20 = vld [vmem:[%s4612_s10 + $0x118] sm:$0xff] }
  0x18   :  { %205 = vmatpush.msra.mxu1 %v153_v47  ;;  %228 = vmatpush.msra.mxu2 %v122_v49  ;;  %v2879_v21 = vld [vmem:[%s4606_s4 + $0x38] sm:$0xff]  ;;  %v142_v24 = vld [vmem:[%s4612_s10 + $0x108] sm:$0xff]  ;;  %v2878_v26 = vld [vmem:[%s4606_s4 + $0x30] sm:$0xff] }
  0x19   :  { %250 = vmatpush.msra.mxu3 %v156_v50  ;;  %183 = vmatpush.msra.mxu0 %v119_v53  ;;  %v2887_v22 = vld [vmem:[%s4606_s4 + $0x78] sm:$0xff]  ;;  %v2894_v28 = vld [vmem:[%s4606_s4 + $0xb0] sm:$0xff]  ;;  %v2893_v32 = vld [vmem:[%s4606_s4 + $0xa8] sm:$0xff] }
  0x1a   :  { %206 = vmatpush.msra.mxu1 %v151_v54  ;;  %229 = vmatpush.msra.mxu2 %v120_v55  ;;  %v2895_v23 = vld [vmem:[%s4606_s4 + $0xb8] sm:$0xff]  ;;  %v2902_v29 = vld [vmem:[%s4606_s4 + $0xf0] sm:$0xff]  ;;  %v2901_v33 = vld [vmem:[%s4606_s4 + $0xe8] sm:$0xff] }
  0x1b   :  { %251 = vmatpush.msra.mxu3 %v154_v56  ;;  %184 = vmatpush.msra.mxu0 %v117_v60  ;;  %v2903_v25 = vld [vmem:[%s4606_s4 + $0xf8] sm:$0xff]  ;;  %v2876_v34 = vld [vmem:[%s4606_s4 + $0x20] sm:$0xff]  ;;  %v2874_v42 = vld [vmem:[%s4606_s4 + $0x10] sm:$0xff] }
  0x1c   :  { %207 = vmatpush.msra.mxu1 %v149_v61  ;;  %230 = vmatpush.msra.mxu2 %v118_v63  ;;  %v2884_v35 = vld [vmem:[%s4606_s4 + $0x60] sm:$0xff]  ;;  %v2875_v38 = vld [vmem:[%s4606_s4 + $0x18] sm:$0xff]  ;;  %v2882_v43 = vld [vmem:[%s4606_s4 + $0x50] sm:$0xff] }
  0x1d   :  { %185 = vmatpush.msra.mxu0 %v115_v2  ;;  %v2883_v39 = vld [vmem:[%s4606_s4 + $0x58] sm:$0xff]  ;;  %v2890_v44 = vld [vmem:[%s4606_s4 + $0x90] sm:$0xff]  ;;  %v2873_v46 = vld [vmem:[%s4606_s4 + $0x8] sm:$0xff] }
  0x1e   :  { %v2891_v40 = vld [vmem:[%s4606_s4 + $0x98] sm:$0xff]  ;;  %v2898_v45 = vld [vmem:[%s4606_s4 + $0xd0] sm:$0xff]  ;;  %v2881_v47 = vld [vmem:[%s4606_s4 + $0x48] sm:$0xff] }
  0x1f   :  { %186 = vmatpush.msra.mxu0 %v113_v6  ;;  %v2899_v41 = vld [vmem:[%s4606_s4 + $0xd8] sm:$0xff]  ;;  %v2897_v49 = vld [vmem:[%s4606_s4 + $0xc8] sm:$0xff]  ;;  %v2872_v50 = vld [vmem:[%s4606_s4] sm:$0xff] }
  0x20   :  { %v2896_v53 = vld [vmem:[%s4606_s4 + $0xc0] sm:$0xff] }
  0x21   :  { %187 = vmatpush.msra.mxu0 %v111_v10 }
  0x23   :  { %188 = vmatpush.msra.mxu0 %v109_v15 }
  0x25   :  { %1389 = vmatpush.bf16.msrb.mxu0 %v2879_v21  ;;  %v2926_v21 = vld [vmem:[%s4606_s4 + $0x1b0] sm:$0xff] }
  0x29   :  { %1390 = vmatpush.bf16.msrb.mxu0 %v2878_v26 }
  0x77   :  { %v51_v27 = vpop.xlane.xlu0 %50 }
  0x78   :  { %v55_v30 = vsub.f32 %v45_v0, %v51_v27  ;;  %v56_v31 = vsub.f32 %v46_v1, %v51_v27  ;;  %v152_v1 = vld [vmem:[%s4612_s10 + $0x158] sm:$0xff]  ;;  %v2886_v27 = vld [vmem:[%s4606_s4 + $0x70] sm:$0xff] }
  0x79   :  { %252 = vmatpush.msra.mxu3 %v152_v1 }
  0x7a   :  { %v59_v36 = vmul.f32 1.442695, %v55_v30  ;;  %v61_v37 = vmul.f32 1.442695, %v56_v31  ;;  %v2877_v30 = vld [vmem:[%s4606_s4 + $0x28] sm:$0xff] }
  0x7b   :  { %253 = vmatpush.msra.mxu3 %v150_v5  ;;  %v2885_v31 = vld [vmem:[%s4606_s4 + $0x68] sm:$0xff]  ;;  %1391 = vmatpush.bf16.msrb.mxu0 %v2877_v30  ;;  %v2908_v30 = vld [vmem:[%s4606_s4 + $0x120] sm:$0xff] }
  0x7c   :  { %3022 = vpow2.f32 %v59_v36  ;;  %v2892_v36 = vld [vmem:[%s4606_s4 + $0xa0] sm:$0xff] }
  0x7d   :  { %3024 = vpow2.f32 %v61_v37  ;;  %254 = vmatpush.msra.mxu3 %v148_v9  ;;  %v2900_v37 = vld [vmem:[%s4606_s4 + $0xe0] sm:$0xff] }
  0x7f   :  { %v54_v48 = vpop.xlane.xlu0 %53  ;;  %255 = vmatpush.msra.mxu3 %v146_v14  ;;  %1392 = vmatpush.bf16.msrb.mxu0 %v2876_v34  ;;  %v2927_v14 = vld [vmem:[%s4606_s4 + $0x1b8] sm:$0xff]  ;;  %v2856_v34 = vld [vmem:[%s4603_s1 + $0x4] sm:$0xf] }
  0x80   :  { %v57_v51 = vsub.f32 %v3226_v3, %v54_v48  ;;  %v58_v52 = vsub.f32 %v3231_v4, %v54_v48  ;;  %v147_v3 = vld [vmem:[%s4612_s10 + $0x130] sm:$0xff]  ;;  %v116_v4 = vld [vmem:[%s4612_s10 + $0x38] sm:$0xff]  ;;  %v2889_v48 = vld [vmem:[%s4606_s4 + $0x88] sm:$0xff] }
  0x81   :  { %208 = vmatpush.msra.mxu1 %v147_v3  ;;  %231 = vmatpush.msra.mxu2 %v116_v4 }
  0x82   :  { %v3366_v57 = vpop.eup %3022  ;;  %v63_v58 = vmul.f32 1.442695, %v57_v51  ;;  %v65_v59 = vmul.f32 1.442695, %v58_v52  ;;  %256 = vmatpush.msra.mxu3 %v144_v20  ;;  %v2880_v51 = vld [vmem:[%s4606_s4 + $0x40] sm:$0xff]  ;;  %v2918_v20 = vld [vmem:[%s4606_s4 + $0x170] sm:$0xff] }
  0x83   :  { %v3374_v62 = vpop.eup %3024  ;;  %209 = vmatpush.msra.mxu1 %v145_v7  ;;  %232 = vmatpush.msra.mxu2 %v114_v8  ;;  %v2888_v52 = vld [vmem:[%s4606_s4 + $0x80] sm:$0xff] }
  0x84   :  { %3026 = vpow2.f32 %v63_v58  ;;  %v67_v0 = vadd.f32 %v3374_v62, %v3366_v57  ;;  %257 = vmatpush.msra.mxu3 %v142_v24  ;;  %1393 = vmatpush.bf16.msrb.mxu0 %v2875_v38  ;;  %v2273_v38 = vld [vmem:[%s4603_s1 + $0x48] sm:$0xf0] }
  0x85   :  { %3028 = vpow2.f32 %v65_v59  ;;  %210 = vmatpush.msra.mxu1 %v143_v11  ;;  %233 = vmatpush.msra.mxu2 %v112_v12  ;;  %v2911_v11 = vld [vmem:[%s4606_s4 + $0x138] sm:$0xff] }
  0x86   :  { %68 = vadd.xlane.f32.xlu1 %v67_v0  ;;  %1431 = vmatpush.bf16.msrb.mxu3 %v2903_v25  ;;  %v2919_v12 = vld [vmem:[%s4606_s4 + $0x178] sm:$0xff] }
  0x87   :  { %211 = vmatpush.msra.mxu1 %v141_v17  ;;  %234 = vmatpush.msra.mxu2 %v110_v18 }
  0x88   :  { %1394 = vmatpush.bf16.msrb.mxu0 %v2874_v42 }
  0x89   :  { %1403 = vmatpush.bf16.msrb.mxu1 %v2887_v22  ;;  %1417 = vmatpush.bf16.msrb.mxu2 %v2895_v23  ;;  %v2934_v22 = vld [vmem:[%s4606_s4 + $0x1f0] sm:$0xff] }
  0x8a   :  { %v3417_v13 = vpop.eup %3026  ;;  %1432 = vmatpush.bf16.msrb.mxu3 %v2902_v29  ;;  %v2925_v29 = vld [vmem:[%s4606_s4 + $0x1a8] sm:$0xff] }
  0x8b   :  { %v3425_v16 = vpop.eup %3028 }
  0x8c   :  { %v70_v19 = vadd.f32 %v3425_v16, %v3417_v13  ;;  %1395 = vmatpush.bf16.msrb.mxu0 %v2873_v46  ;;  %v2915_v46 = vld [vmem:[%s4606_s4 + $0x158] sm:$0xff] }
  0x8d   :  { %1404 = vmatpush.bf16.msrb.mxu1 %v2886_v27  ;;  %1418 = vmatpush.bf16.msrb.mxu2 %v2894_v28  ;;  %v2909_v27 = vld [vmem:[%s4606_s4 + $0x128] sm:$0xff] }
  0x8e   :  { %71 = vadd.xlane.f32.xlu1 %v70_v19  ;;  %1433 = vmatpush.bf16.msrb.mxu3 %v2901_v33  ;;  %v2910_v19 = vld [vmem:[%s4606_s4 + $0x130] sm:$0xff]  ;;  %v2917_v28 = vld [vmem:[%s4606_s4 + $0x168] sm:$0xff]  ;;  %v2916_v33 = vld [vmem:[%s4606_s4 + $0x160] sm:$0xff] }
  0x90   :  { %1396 = vmatpush.bf16.msrb.mxu0 %v2872_v50  ;;  %v2914_v50 = vld [vmem:[%s4606_s4 + $0x150] sm:$0xff] }
  0x91   :  { %1405 = vmatpush.bf16.msrb.mxu1 %v2885_v31  ;;  %1419 = vmatpush.bf16.msrb.mxu2 %v2893_v32  ;;  %v2864_v31 = vld [vmem:[%s4603_s1 + $0x3c] sm:$0xf0]  ;;  %v2271_v32 = vld [vmem:[%s4603_s1 + $0x8] sm:$0xf] }
  0x92   :  { %1434 = vmatpush.bf16.msrb.mxu3 %v2900_v37  ;;  %v2857_v37 = vld [vmem:[%s4603_s1 + $0xc] sm:$0xf] }
  0x95   :  { %1406 = vmatpush.bf16.msrb.mxu1 %v2884_v35  ;;  %1420 = vmatpush.bf16.msrb.mxu2 %v2892_v36  ;;  %v2265_v35 = vld [vmem:[%s4603_s1 + $0x40] sm:$0xf0]  ;;  %v2865_v36 = vld [vmem:[%s4603_s1 + $0x44] sm:$0xf0] }
  0x96   :  { %1435 = vmatpush.bf16.msrb.mxu3 %v2899_v41  ;;  %v2268_v42 = vor.u32 %v2856_v34, %v2265_v35  ;;  %v2946_v34 = vld [vmem:[%s4606_s4 + $0x250] sm:$0xff] }
  0x97   :  { %v2954_v35 = vld [vmem:[%s4606_s4 + $0x290] sm:$0xff] }
  0x99   :  { %1407 = vmatpush.bf16.msrb.mxu1 %v2883_v39  ;;  %1421 = vmatpush.bf16.msrb.mxu2 %v2891_v40  ;;  %v2924_v39 = vld [vmem:[%s4606_s4 + $0x1a0] sm:$0xff] }
  0x9a   :  { %1436 = vmatpush.bf16.msrb.mxu3 %v2898_v45  ;;  %v2932_v40 = vld [vmem:[%s4606_s4 + $0x1e0] sm:$0xff]  ;;  %v2907_v45 = vld [vmem:[%s4606_s4 + $0x118] sm:$0xff] }
  0x9d   :  { %1408 = vmatpush.bf16.msrb.mxu1 %v2882_v43  ;;  %1422 = vmatpush.bf16.msrb.mxu2 %v2890_v44  ;;  %v2272_v43 = vor.u32 %v2865_v36, %v2271_v32  ;;  %v2276_v44 = vor.u32 %v2857_v37, %v2273_v38  ;;  %v2963_v32 = vld [vmem:[%s4606_s4 + $0x2d8] sm:$0xff]  ;;  %v2962_v36 = vld [vmem:[%s4606_s4 + $0x2d0] sm:$0xff]  ;;  %v2937_v37 = vld [vmem:[%s4606_s4 + $0x208] sm:$0xff] }
  0x9e   :  { %1437 = vmatpush.bf16.msrb.mxu3 %v2897_v49  ;;  %v2906_v49 = vld [vmem:[%s4606_s4 + $0x110] sm:$0xff]  ;;  %v2945_v38 = vld [vmem:[%s4606_s4 + $0x248] sm:$0xff] }
  0xa1   :  { %1409 = vmatpush.bf16.msrb.mxu1 %v2881_v47  ;;  %1423 = vmatpush.bf16.msrb.mxu2 %v2889_v48  ;;  %v2923_v47 = vld [vmem:[%s4606_s4 + $0x198] sm:$0xff] }
  0xa2   :  { %1438 = vmatpush.bf16.msrb.mxu3 %v2896_v53  ;;  %v2931_v48 = vld [vmem:[%s4606_s4 + $0x1d8] sm:$0xff]  ;;  %v2905_v53 = vld [vmem:[%s4606_s4 + $0x108] sm:$0xff] }
  0xa5   :  { %1410 = vmatpush.bf16.msrb.mxu1 %v2880_v51  ;;  %1424 = vmatpush.bf16.msrb.mxu2 %v2888_v52  ;;  %v2922_v51 = vld [vmem:[%s4606_s4 + $0x190] sm:$0xff] }
  0xa6   :  { %v2930_v52 = vld [vmem:[%s4606_s4 + $0x1d0] sm:$0xff] }
  0xf9   :  { %v69_v54 = vpop.xlane.xlu1 %68 }
  0xfa   :  { %3030 = vrcp.f32 %v69_v54  ;;  %v84_v60 = vand.u32 2147483648, %v69_v54  ;;  %v82_v63 = vand.u32 2147483647, %v69_v54  ;;  %vm78_vm1 = vweird.f32 %v69_v54 }
  0xfc   :  { %v85_v2 = vor.u32 1.1754944e-38, %v84_v60  ;;  %vm83_vm3 = vcmp.eq.f32.partialorder %v82_v63, 8.507059e+37  ;;  %v2920_v60 = vld [vmem:[%s4606_s4 + $0x180] sm:$0xff]  ;;  %v2279_v63 = vld [vmem:[%s4603_s1 + $0x10] sm:$0xf] }
 0x100   :  { %v3031_v55 = vpop.eup %3030 }
 0x101   :  { %v74_v56 = vmul.f32 %v3031_v55, %v69_v54  ;;  %v72_v58 = vpop.xlane.xlu1 %71  ;;  %vm79_vm0 = vweird.f32 %v3031_v55  ;;  %v2913_v54 = vld [vmem:[%s4606_s4 + $0x148] sm:$0xff] }
 0x102   :  { %3032 = vrcp.f32 %v72_v58  ;;  %vm80_vm2 = vmor %vm78_vm1, %vm79_vm0  ;;  %vm94_vm4 = vweird.f32 %v72_v58  ;;  %v98_v5 = vand.u32 2147483647, %v72_v58  ;;  %v100_v6 = vand.u32 2147483648, %v72_v58 }
 0x103   :  { %v75_v59 = vsub.f32 1.0, %v74_v56  ;;  %v2929_v56 = vld [vmem:[%s4606_s4 + $0x1c8] sm:$0xff] }
 0x104   :  { %v101_v17 = vor.u32 1.1754944e-38, %v100_v6  ;;  %vm99_vm7 = vcmp.eq.f32.partialorder %v98_v5, 8.507059e+37  ;;  %v2858_v5 = vld [vmem:[%s4603_s1 + $0x14] sm:$0xf] }
 0x105   :  { %v76_v61 = vmul.f32 %v3031_v55, %v75_v59  ;;  %v2912_v59 = vld [vmem:[%s4606_s4 + $0x140] sm:$0xff]  ;;  %v2281_v6 = vld [vmem:[%s4603_s1 + $0x50] sm:$0xf0] }
 0x107   :  { %v77_v0 = vadd.f32 %v3031_v55, %v76_v61  ;;  %v2943_v61 = vld [vmem:[%s4606_s4 + $0x238] sm:$0xff] }
 0x108   :  { %v3033_v1 = vpop.eup %3032 }
 0x109   :  { %v90_v3 = vmul.f32 %v3033_v1, %v72_v58  ;;  %v81_v4 = vsel %vm80_vm2, %v3031_v55, %v77_v0  ;;  %vm95_vm5 = vweird.f32 %v3033_v1  ;;  %v2921_v55 = vld [vmem:[%s4606_s4 + $0x188] sm:$0xff]  ;;  %v2904_v58 = vld [vmem:[%s4606_s4 + $0x100] sm:$0xff]  ;;  %v2866_v0 = vld [vmem:[%s4603_s1 + $0x4c] sm:$0xf0] }
 0x10a   :  { %v86_v7 = vsel %vm83_vm3, %v85_v2, %v81_v4  ;;  %vm3559_vm6 = vmor %vm94_vm4, %vm95_vm5  ;;  %v2287_v2 = vld [vmem:[%s4603_s1 + $0x18] sm:$0xf] }
 0x10b   :  { %v91_v8 = vsub.f32 1.0, %v90_v3  ;;  %v3538_v9 = vmul.f32 %v3366_v57, %v86_v7  ;;  %v3541_v10 = vmul.f32 %v3374_v62, %v86_v7  ;;  %v2935_v57 = vld [vmem:[%s4606_s4 + $0x1f8] sm:$0xff]  ;;  %v2928_v7 = vld [vmem:[%s4606_s4 + $0x1c0] sm:$0xff]  ;;  %v2284_v62 = vor.u32 %v2858_v5, %v2281_v6  ;;  %v2989_v5 = vld [vmem:[%s4606_s4 + $0x3a8] sm:$0xff] }
 0x10c   :  { %v2867_v3 = vld [vmem:[%s4603_s1 + $0x54] sm:$0xf0]  ;;  %v2997_v6 = vld [vmem:[%s4606_s4 + $0x3e8] sm:$0xff] }
 0x10d   :  { %v92_v15 = vmul.f32 %v3033_v1, %v91_v8  ;;  %105 = vst [vmem:[#allocation6] sm:$0xff] %v3538_v9  ;;  %189 = vmatmul.f32.vlgmr.msra.gmra.mxu0 %v3538_v9  ;;  %212 = vmatmul.f32.vlgmr.msra.gmra.mxu1 %v3541_v10  ;;  %v2959_v4 = vld [vmem:[%s4606_s4 + $0x2b8] sm:$0xff]  ;;  %v2280_v8 = vor.u32 %v2866_v0, %v2279_v63  ;;  %v2974_v63 = vld [vmem:[%s4606_s4 + $0x330] sm:$0xff] }
 0x10e   :  { %106 = vst [vmem:[#allocation6 + $0x8] sm:$0xff] %v3541_v10  ;;  %235 = vmatmul.f32.vlgmr.msra.gmra.mxu2 %v3538_v9  ;;  %258 = vmatmul.f32.vlgmr.msra.gmra.mxu3 %v3541_v10  ;;  %v2982_v0 = vld [vmem:[%s4606_s4 + $0x370] sm:$0xff] }
 0x10f   :  { %v93_v18 = vadd.f32 %v3033_v1, %v92_v15  ;;  %1445 = vmatpush.bf16.msra.mxu0 %v2911_v11  ;;  %1459 = vmatpush.bf16.msra.mxu1 %v2919_v12  ;;  %v2967_v11 = vld [vmem:[%s4606_s4 + $0x2f8] sm:$0xff]  ;;  %v2288_v12 = vor.u32 %v2867_v3, %v2287_v2  ;;  %v2942_v15 = vld [vmem:[%s4606_s4 + $0x230] sm:$0xff]  ;;  %v2973_v3 = vld [vmem:[%s4606_s4 + $0x328] sm:$0xff] }
 0x110   :  { %1473 = vmatpush.bf16.msra.mxu2 %v2927_v14  ;;  %1487 = vmatpush.bf16.msra.mxu3 %v2935_v57  ;;  %v2859_v14 = vld [vmem:[%s4603_s1 + $0x1c] sm:$0xf]  ;;  %v2998_v2 = vld [vmem:[%s4606_s4 + $0x3f0] sm:$0xff] }
 0x111   :  { %v97_v23 = vsel %vm3559_vm6, %v3033_v1, %v93_v18  ;;  %v2951_v1 = vld [vmem:[%s4606_s4 + $0x278] sm:$0xff]  ;;  %v2958_v18 = vld [vmem:[%s4606_s4 + $0x2b0] sm:$0xff] }
 0x112   :  { %v102_v24 = vsel %vm99_vm7, %v101_v17, %v97_v23  ;;  %v2289_v57 = vld [vmem:[%s4603_s1 + $0x58] sm:$0xf0]  ;;  %v2950_v17 = vld [vmem:[%s4606_s4 + $0x270] sm:$0xff]  ;;  %v2957_v23 = vld [vmem:[%s4606_s4 + $0x2a8] sm:$0xff] }
 0x113   :  { %1446 = vmatpush.bf16.msra.mxu0 %v2910_v19  ;;  %1460 = vmatpush.bf16.msra.mxu1 %v2918_v20  ;;  %v3581_v25 = vmul.f32 %v3417_v13, %v102_v24  ;;  %v3584_v26 = vmul.f32 %v3425_v16, %v102_v24  ;;  %v2933_v13 = vld [vmem:[%s4606_s4 + $0x1e8] sm:$0xff]  ;;  %v2263_v16 = vld [vmem:[%s4603_s1] sm:$0xf]  ;;  %v2292_v19 = vor.u32 %v2859_v14, %v2289_v57  ;;  %v2966_v20 = vld [vmem:[%s4606_s4 + $0x2f0] sm:$0xff] }
 0x114   :  { %1474 = vmatpush.bf16.msra.mxu2 %v2926_v21  ;;  %1488 = vmatpush.bf16.msra.mxu3 %v2934_v22  ;;  %v2264_v41 = vor.u32 %v2864_v31, %v2263_v16  ;;  %v2941_v21 = vld [vmem:[%s4606_s4 + $0x228] sm:$0xff]  ;;  %v2939_v16 = vld [vmem:[%s4606_s4 + $0x218] sm:$0xff] }
 0x115   :  { %107 = vst [vmem:[#allocation6 + $0x10] sm:$0xff] %v3581_v25  ;;  %192 = vmatmul.f32.gmra.mxu0 %v3581_v25  ;;  %215 = vmatmul.f32.gmra.mxu1 %v3584_v26  ;;  %v2949_v22 = vld [vmem:[%s4606_s4 + $0x268] sm:$0xff]  ;;  %v2955_v31 = vld [vmem:[%s4606_s4 + $0x298] sm:$0xff] }
 0x116   :  { %108 = vst [vmem:[#allocation6 + $0x18] sm:$0xff] %v3584_v26  ;;  %238 = vmatmul.f32.gmra.mxu2 %v3581_v25  ;;  %261 = vmatmul.f32.gmra.mxu3 %v3584_v26  ;;  %v2965_v24 = vld [vmem:[%s4606_s4 + $0x2e8] sm:$0xff]  ;;  %v2971_v14 = vld [vmem:[%s4606_s4 + $0x318] sm:$0xff] }
 0x117   :  { %1447 = vmatpush.bf16.msra.mxu0 %v2909_v27  ;;  %1461 = vmatpush.bf16.msra.mxu1 %v2917_v28  ;;  %v2940_v27 = vld [vmem:[%s4606_s4 + $0x220] sm:$0xff]  ;;  %v2979_v57 = vld [vmem:[%s4606_s4 + $0x358] sm:$0xff] }
 0x118   :  { %1475 = vmatpush.bf16.msra.mxu2 %v2925_v29  ;;  %1489 = vmatpush.bf16.msra.mxu3 %v2933_v13  ;;  %v2948_v28 = vld [vmem:[%s4606_s4 + $0x260] sm:$0xff] }
 0x119   :  { %v2956_v29 = vld [vmem:[%s4606_s4 + $0x2a0] sm:$0xff] }
 0x11a   :  { %v2964_v13 = vld [vmem:[%s4606_s4 + $0x2e0] sm:$0xff] }
 0x11b   :  { %1448 = vmatpush.bf16.msra.mxu0 %v2908_v30  ;;  %1462 = vmatpush.bf16.msra.mxu1 %v2916_v33  ;;  %v2947_v30 = vld [vmem:[%s4606_s4 + $0x258] sm:$0xff]  ;;  %v2938_v33 = vld [vmem:[%s4606_s4 + $0x210] sm:$0xff] }
 0x11c   :  { %1476 = vmatpush.bf16.msra.mxu2 %v2924_v39  ;;  %1490 = vmatpush.bf16.msra.mxu3 %v2932_v40  ;;  %v2953_v39 = vld [vmem:[%s4606_s4 + $0x288] sm:$0xff] }
 0x11d   :  { %1397 = vmatmul.bf16.vlgmr.msrb.gmra.mxu0 %v2264_v41  ;;  %1411 = vmatmul.bf16.vlgmr.msrb.gmra.mxu1 %v2268_v42  ;;  %v2961_v40 = vld [vmem:[%s4606_s4 + $0x2c8] sm:$0xff]  ;;  %v2936_v41 = vld [vmem:[%s4606_s4 + $0x200] sm:$0xff] }
 0x11e   :  { %1425 = vmatmul.bf16.vlgmr.msrb.gmra.mxu2 %v2272_v43  ;;  %1439 = vmatmul.bf16.vlgmr.msrb.gmra.mxu3 %v2276_v44  ;;  %v2944_v42 = vld [vmem:[%s4606_s4 + $0x240] sm:$0xff]  ;;  %v2975_v44 = vld [vmem:[%s4606_s4 + $0x338] sm:$0xff] }
 0x11f   :  { %1449 = vmatpush.bf16.msra.mxu0 %v2907_v45  ;;  %1463 = vmatpush.bf16.msra.mxu1 %v2915_v46  ;;  %v2952_v43 = vld [vmem:[%s4606_s4 + $0x280] sm:$0xff]  ;;  %v2983_v45 = vld [vmem:[%s4606_s4 + $0x378] sm:$0xff] }
 0x120   :  { %1477 = vmatpush.bf16.msra.mxu2 %v2923_v47  ;;  %1491 = vmatpush.bf16.msra.mxu3 %v2931_v48  ;;  %v2295_v46 = vld [vmem:[%s4603_s1 + $0x20] sm:$0xf]  ;;  %v2303_v48 = vld [vmem:[%s4603_s1 + $0x28] sm:$0xf] }
 0x121   :  { %v2868_v47 = vld [vmem:[%s4603_s1 + $0x5c] sm:$0xf0] }
 0x123   :  { %1450 = vmatpush.bf16.msra.mxu0 %v2906_v49  ;;  %1464 = vmatpush.bf16.msra.mxu1 %v2914_v50  ;;  %v2869_v49 = vld [vmem:[%s4603_s1 + $0x64] sm:$0xf0]  ;;  %v2991_v50 = vld [vmem:[%s4606_s4 + $0x3b8] sm:$0xff] }
 0x124   :  { %1478 = vmatpush.bf16.msra.mxu2 %v2922_v51  ;;  %1492 = vmatpush.bf16.msra.mxu3 %v2930_v52  ;;  %v2860_v51 = vld [vmem:[%s4603_s1 + $0x24] sm:$0xf] }
 0x125   :  { %v2297_v52 = vld [vmem:[%s4603_s1 + $0x60] sm:$0xf0] }
 0x127   :  { %1451 = vmatpush.bf16.msra.mxu0 %v2905_v53  ;;  %1465 = vmatpush.bf16.msra.mxu1 %v2913_v54  ;;  %v2960_v53 = vld [vmem:[%s4606_s4 + $0x2c0] sm:$0xff]  ;;  %v2861_v54 = vld [vmem:[%s4603_s1 + $0x2c] sm:$0xf] }
 0x128   :  { %1479 = vmatpush.bf16.msra.mxu2 %v2921_v55  ;;  %1493 = vmatpush.bf16.msra.mxu3 %v2929_v56  ;;  %v2305_v55 = vld [vmem:[%s4603_s1 + $0x68] sm:$0xf0]  ;;  %v2296_v56 = vor.u32 %v2868_v47, %v2295_v46  ;;  %v1625_v47 = vld [vmem:[%s4605_s3 + $0x60] sm:$0xff] }
 0x129   :  { %v1642_v46 = vld [vmem:[%s4605_s3 + $0xe8] sm:$0xff] }
 0x12b   :  { %1452 = vmatpush.bf16.msra.mxu0 %v2904_v58  ;;  %1466 = vmatpush.bf16.msra.mxu1 %v2912_v59  ;;  %v2304_v58 = vor.u32 %v2869_v49, %v2303_v48  ;;  %v2999_v59 = vld [vmem:[%s4606_s4 + $0x3f8] sm:$0xff]  ;;  %v1641_v48 = vld [vmem:[%s4605_s3 + $0xe0] sm:$0xff] }
 0x12c   :  { %1480 = vmatpush.bf16.msra.mxu2 %v2920_v60  ;;  %1494 = vmatpush.bf16.msra.mxu3 %v2928_v7  ;;  %v2300_v60 = vor.u32 %v2860_v51, %v2297_v52  ;;  %v2972_v7 = vld [vmem:[%s4606_s4 + $0x320] sm:$0xff]  ;;  %v1624_v49 = vld [vmem:[%s4605_s3 + $0x58] sm:$0xff]  ;;  %v1623_v51 = vld [vmem:[%s4605_s3 + $0x50] sm:$0xff] }
 0x12d   :  { %v1639_v52 = vld [vmem:[%s4605_s3 + $0xd0] sm:$0xff] }
 0x12e   :  { %1453 = vmatmul.bf16.vlgmr.msra.gmra.mxu0 %v2280_v8  ;;  %1467 = vmatmul.bf16.vlgmr.msra.gmra.mxu1 %v2284_v62  ;;  %v2980_v8 = vld [vmem:[%s4606_s4 + $0x360] sm:$0xff]  ;;  %v2995_v62 = vld [vmem:[%s4606_s4 + $0x3d8] sm:$0xff] }
 0x12f   :  { %1501 = vmatpush.bf16.msrb.mxu0 %v2943_v61  ;;  %1515 = vmatpush.bf16.msrb.mxu1 %v2951_v1  ;;  %v2308_v61 = vor.u32 %v2861_v54, %v2305_v55  ;;  %v2990_v1 = vld [vmem:[%s4606_s4 + $0x3b0] sm:$0xff]  ;;  %v1693_v54 = vld [vmem:[%s4607_s5] sm:$0xff]  ;;  %v1622_v55 = vld [vmem:[%s4605_s3 + $0x48] sm:$0xff] }
 0x130   :  { %1529 = vmatpush.bf16.msrb.mxu2 %v2959_v4  ;;  %1543 = vmatpush.bf16.msrb.mxu3 %v2967_v11  ;;  %v2981_v4 = vld [vmem:[%s4606_s4 + $0x368] sm:$0xff]  ;;  %v2988_v11 = vld [vmem:[%s4606_s4 + $0x3a0] sm:$0xff] }
 0x131   :  { %1481 = vmatmul.bf16.vlgmr.msra.gmra.mxu2 %v2288_v12  ;;  %1495 = vmatmul.bf16.vlgmr.msra.gmra.mxu3 %v2292_v19  ;;  %v2996_v12 = vld [vmem:[%s4606_s4 + $0x3e0] sm:$0xff]  ;;  %v2986_v19 = vld [vmem:[%s4606_s4 + $0x390] sm:$0xff] }
 0x133   :  { %1502 = vmatpush.bf16.msrb.mxu0 %v2942_v15  ;;  %1516 = vmatpush.bf16.msrb.mxu1 %v2950_v17  ;;  %v2987_v15 = vld [vmem:[%s4606_s4 + $0x398] sm:$0xff]  ;;  %v2970_v17 = vld [vmem:[%s4606_s4 + $0x310] sm:$0xff] }
 0x134   :  { %1530 = vmatpush.bf16.msrb.mxu2 %v2958_v18  ;;  %1544 = vmatpush.bf16.msrb.mxu3 %v2966_v20  ;;  %v2978_v18 = vld [vmem:[%s4606_s4 + $0x350] sm:$0xff] }
 0x135   :  { %v2994_v20 = vld [vmem:[%s4606_s4 + $0x3d0] sm:$0xff] }
 0x137   :  { %1503 = vmatpush.bf16.msrb.mxu0 %v2941_v21  ;;  %1517 = vmatpush.bf16.msrb.mxu1 %v2949_v22  ;;  %v2969_v21 = vld [vmem:[%s4606_s4 + $0x308] sm:$0xff] }
 0x138   :  { %1531 = vmatpush.bf16.msrb.mxu2 %v2957_v23  ;;  %1545 = vmatpush.bf16.msrb.mxu3 %v2965_v24  ;;  %v2977_v22 = vld [vmem:[%s4606_s4 + $0x348] sm:$0xff] }
 0x139   :  { %v2985_v23 = vld [vmem:[%s4606_s4 + $0x388] sm:$0xff] }
 0x13a   :  { %v2993_v24 = vld [vmem:[%s4606_s4 + $0x3c8] sm:$0xff] }
 0x13b   :  { %1504 = vmatpush.bf16.msrb.mxu0 %v2940_v27  ;;  %1518 = vmatpush.bf16.msrb.mxu1 %v2948_v28  ;;  %v2968_v27 = vld [vmem:[%s4606_s4 + $0x300] sm:$0xff] }
 0x13c   :  { %1532 = vmatpush.bf16.msrb.mxu2 %v2956_v29  ;;  %1546 = vmatpush.bf16.msrb.mxu3 %v2964_v13  ;;  %v2976_v28 = vld [vmem:[%s4606_s4 + $0x340] sm:$0xff]  ;;  %v2311_v13 = vld [vmem:[%s4603_s1 + $0x30] sm:$0xf] }
 0x13d   :  { %v2984_v29 = vld [vmem:[%s4606_s4 + $0x380] sm:$0xff] }
 0x13f   :  { %1505 = vmatpush.bf16.msrb.mxu0 %v2939_v16  ;;  %1519 = vmatpush.bf16.msrb.mxu1 %v2947_v30  ;;  %v2870_v16 = vld [vmem:[%s4603_s1 + $0x6c] sm:$0xf0]  ;;  %v1628_v30 = vld [vmem:[%s4605_s3 + $0x78] sm:$0xff] }
 0x140   :  { %1533 = vmatpush.bf16.msrb.mxu2 %v2955_v31  ;;  %1547 = vmatpush.bf16.msrb.mxu3 %v2963_v32  ;;  %v2319_v31 = vld [vmem:[%s4603_s1 + $0x38] sm:$0xf] }
 0x141   :  { %v2871_v32 = vld [vmem:[%s4603_s1 + $0x74] sm:$0xf0] }
 0x143   :  { %1506 = vmatpush.bf16.msrb.mxu0 %v2938_v33  ;;  %1520 = vmatpush.bf16.msrb.mxu1 %v2946_v34  ;;  %v1644_v33 = vld [vmem:[%s4605_s3 + $0xf8] sm:$0xff]  ;;  %v2992_v34 = vld [vmem:[%s4606_s4 + $0x3c0] sm:$0xff]  ;;  %s2222_s4 = sshll.u32 %s4615_s13, 4  ;;  %s2223_s4 = int_to_ptr.hbm [resolvable:$true] %s2222_s4 }
 0x144   :  { %1534 = vmatpush.bf16.msrb.mxu2 %v2954_v35  ;;  %1548 = vmatpush.bf16.msrb.mxu3 %v2962_v36  ;;  %v2862_v35 = vld [vmem:[%s4603_s1 + $0x34] sm:$0xf]  ;;  %v2312_v36 = vor.u32 %v2870_v16, %v2311_v13 }
 0x147   :  { %1507 = vmatpush.bf16.msrb.mxu0 %v2937_v37  ;;  %1521 = vmatpush.bf16.msrb.mxu1 %v2945_v38  ;;  %v2313_v37 = vld [vmem:[%s4603_s1 + $0x70] sm:$0xf0]  ;;  %v2863_v38 = vld [vmem:[%s4603_s1 + $0x3c] sm:$0xf] }
 0x148   :  { %1535 = vmatpush.bf16.msrb.mxu2 %v2953_v39  ;;  %1549 = vmatpush.bf16.msrb.mxu3 %v2961_v40  ;;  %v2321_v39 = vld [vmem:[%s4603_s1 + $0x78] sm:$0xf0]  ;;  %v2320_v40 = vor.u32 %v2871_v32, %v2319_v31  ;;  %s2235_s1 = sshll.u32 %s4616_s14, 4  ;;  %s2236_s1 = int_to_ptr.hbm [resolvable:$true] %s2235_s1 }
 0x14b   :  { %1508 = vmatpush.bf16.msrb.mxu0 %v2936_v41  ;;  %1522 = vmatpush.bf16.msrb.mxu1 %v2944_v42  ;;  %v1627_v41 = vld [vmem:[%s4605_s3 + $0x70] sm:$0xff] }
 0x14c   :  { %1536 = vmatpush.bf16.msrb.mxu2 %v2952_v43  ;;  %1550 = vmatpush.bf16.msrb.mxu3 %v2960_v53  ;;  %v1643_v42 = vld [vmem:[%s4605_s3 + $0xf0] sm:$0xff]  ;;  %v2316_v43 = vor.u32 %v2862_v35, %v2313_v37  ;;  %v1694_v53 = vld [vmem:[%s4607_s5 + $0x8] sm:$0x3f]  ;;  %s2196_s5 = sshll.u32 %s4613_s11, 4  ;;  %s2197_s5 = int_to_ptr.hbm [resolvable:$true] %s2196_s5 }
 0x14d   :  { %v1742_v35 = vld [vmem:[%s4608_s6 + $0x68] sm:$0xff] }
 0x14e   :  { %1509 = vmatmul.bf16.vlgmr.msrb.gmra.mxu0 %v2296_v56  ;;  %1523 = vmatmul.bf16.vlgmr.msrb.gmra.mxu1 %v2300_v60  ;;  %v1638_v56 = vld [vmem:[%s4605_s3 + $0xc8] sm:$0xff]  ;;  %v1620_v60 = vld [vmem:[%s4605_s3 + $0x38] sm:$0xff] }
 0x14f   :  { %1557 = vmatpush.bf16.msra.mxu0 %v2975_v44  ;;  %1571 = vmatpush.bf16.msra.mxu1 %v2983_v45  ;;  %v2324_v44 = vor.u32 %v2863_v38, %v2321_v39  ;;  %v1626_v45 = vld [vmem:[%s4605_s3 + $0x68] sm:$0xff]  ;;  %v1752_v38 = vld [vmem:[%s4608_s6 + $0xb8] sm:$0xff] }
 0x150   :  { %1585 = vmatpush.bf16.msra.mxu2 %v2991_v50  ;;  %1599 = vmatpush.bf16.msra.mxu3 %v2999_v59  ;;  %v1640_v50 = vld [vmem:[%s4605_s3 + $0xd8] sm:$0xff]  ;;  %v1637_v59 = vld [vmem:[%s4605_s3 + $0xc0] sm:$0xff] }
 0x151   :  { %1537 = vmatmul.bf16.vlgmr.msrb.gmra.mxu2 %v2304_v58  ;;  %1551 = vmatmul.bf16.vlgmr.msrb.gmra.mxu3 %v2308_v61  ;;  %v1621_v58 = vld [vmem:[%s4605_s3 + $0x40] sm:$0xff]  ;;  %v1636_v61 = vld [vmem:[%s4605_s3 + $0xb8] sm:$0xff] }
 0x153   :  { %1558 = vmatpush.bf16.msra.mxu0 %v2974_v63  ;;  %1572 = vmatpush.bf16.msra.mxu1 %v2982_v0  ;;  %v1691_v63 = vld [vmem:[%s4604_s2] sm:$0xff]  ;;  %v1619_v0 = vld [vmem:[%s4605_s3 + $0x30] sm:$0xff] }
 0x154   :  { %1586 = vmatpush.bf16.msra.mxu2 %v2990_v1  ;;  %1600 = vmatpush.bf16.msra.mxu3 %v2998_v2  ;;  %v1635_v1 = vld [vmem:[%s4605_s3 + $0xb0] sm:$0xff]  ;;  %v1618_v2 = vld [vmem:[%s4605_s3 + $0x28] sm:$0xff] }
 0x157   :  { %1559 = vmatpush.bf16.msra.mxu0 %v2973_v3  ;;  %1573 = vmatpush.bf16.msra.mxu1 %v2981_v4  ;;  %v1634_v3 = vld [vmem:[%s4605_s3 + $0xa8] sm:$0xff]  ;;  %v1617_v4 = vld [vmem:[%s4605_s3 + $0x20] sm:$0xff] }
 0x158   :  { %1587 = vmatpush.bf16.msra.mxu2 %v2989_v5  ;;  %1601 = vmatpush.bf16.msra.mxu3 %v2997_v6  ;;  %v1633_v5 = vld [vmem:[%s4605_s3 + $0xa0] sm:$0xff]  ;;  %v1616_v6 = vld [vmem:[%s4605_s3 + $0x18] sm:$0xff] }
 0x15b   :  { %1560 = vmatpush.bf16.msra.mxu0 %v2972_v7  ;;  %1574 = vmatpush.bf16.msra.mxu1 %v2980_v8  ;;  %v1632_v7 = vld [vmem:[%s4605_s3 + $0x98] sm:$0xff]  ;;  %v1692_v8 = vld [vmem:[%s4604_s2 + $0x8] sm:$0xff] }
 0x15c   :  { %1588 = vmatpush.bf16.msra.mxu2 %v2988_v11  ;;  %1602 = vmatpush.bf16.msra.mxu3 %v2996_v12  ;;  %v1615_v11 = vld [vmem:[%s4605_s3 + $0x10] sm:$0xff] }
 0x15d   :  { %v1631_v12 = vld [vmem:[%s4605_s3 + $0x90] sm:$0xff] }
 0x15f   :  { %1561 = vmatpush.bf16.msra.mxu0 %v2971_v14  ;;  %1575 = vmatpush.bf16.msra.mxu1 %v2979_v57  ;;  %v1614_v14 = vld [vmem:[%s4605_s3 + $0x8] sm:$0xff] }
 0x160   :  { %1589 = vmatpush.bf16.msra.mxu2 %v2987_v15  ;;  %1603 = vmatpush.bf16.msra.mxu3 %v2995_v62  ;;  %v1630_v57 = vld [vmem:[%s4605_s3 + $0x88] sm:$0xff]  ;;  %v1613_v15 = vld [vmem:[%s4605_s3] sm:$0xff] }
 0x161   :  { %v1629_v62 = vld [vmem:[%s4605_s3 + $0x80] sm:$0xff]  ;;  %s3136_s3 = smov [#allocation7]  }
 0x162   :  { %s2233_s16 = sshll.u32 %s3136_s3, 4  ;;  %s2234_s16 = int_to_ptr.vmem [resolvable:$true] %s2233_s16 }
 0x163   :  { %1562 = vmatpush.bf16.msra.mxu0 %v2970_v17  ;;  %1576 = vmatpush.bf16.msra.mxu1 %v2978_v18 }
 0x164   :  { %1590 = vmatpush.bf16.msra.mxu2 %v2986_v19  ;;  %1604 = vmatpush.bf16.msra.mxu3 %v2994_v20 }
 0x167   :  { %1563 = vmatpush.bf16.msra.mxu0 %v2969_v21  ;;  %1577 = vmatpush.bf16.msra.mxu1 %v2977_v22 }
 0x168   :  { %1591 = vmatpush.bf16.msra.mxu2 %v2985_v23  ;;  %1605 = vmatpush.bf16.msra.mxu3 %v2993_v24 }
 0x16b   :  { %1564 = vmatpush.bf16.msra.mxu0 %v2968_v27  ;;  %1578 = vmatpush.bf16.msra.mxu1 %v2976_v28 }
 0x16c   :  { %1592 = vmatpush.bf16.msra.mxu2 %v2984_v29  ;;  %1606 = vmatpush.bf16.msra.mxu3 %v2992_v34  ;;  %v1756_v34 = vld [vmem:[%s4608_s6 + $0xd8] sm:$0xff] }
 0x16e   :  { %1565 = vmatmul.bf16.vlgmr.msra.gmra.mxu0 %v2312_v36  ;;  %1579 = vmatmul.bf16.vlgmr.msra.gmra.mxu1 %v2316_v43  ;;  %v1754_v36 = vld [vmem:[%s4608_s6 + $0xc8] sm:$0xff]  ;;  %v1748_v43 = vld [vmem:[%s4608_s6 + $0x98] sm:$0xff] }
 0x16f   :  { %1645 = vmatpush.msrb.mxu0 %v1628_v30  ;;  %1668 = vmatpush.msrb.mxu1 %v1644_v33  ;;  %v1744_v33 = vld [vmem:[%s4608_s6 + $0x78] sm:$0xff] }
 0x170   :  { %1593 = vmatmul.bf16.vlgmr.msra.gmra.mxu2 %v2320_v40  ;;  %1607 = vmatmul.bf16.vlgmr.msra.gmra.mxu3 %v2324_v44 }
 0x171   :  { %1646 = vmatpush.msrb.mxu0 %v1627_v41  ;;  %1669 = vmatpush.msrb.mxu1 %v1643_v42  ;;  %v1750_v42 = vld [vmem:[%s4608_s6 + $0xa8] sm:$0xff] }
 0x172   :  { %2837 = vmatpush.msk.msrb.mxu2 %vm1702_vm8, %v1694_v53  ;;  %v1895_v53 = vld [vmem:[%s4608_s6 + $0x1e8] sm:$0xff] }
 0x173   :  { %1647 = vmatpush.msrb.mxu0 %v1626_v45  ;;  %1670 = vmatpush.msrb.mxu1 %v1642_v46  ;;  %v1740_v46 = vld [vmem:[%s4608_s6 + $0x58] sm:$0xff] }
 0x174   :  { %1721 = vmatpush.msrb.mxu2 %v1693_v54  ;;  %v1759_v54 = vld [vmem:[%s4608_s6 + $0xf0] sm:$0xff] }
 0x175   :  { %1648 = vmatpush.msrb.mxu0 %v1625_v47  ;;  %1671 = vmatpush.msrb.mxu1 %v1641_v48  ;;  %v1746_v47 = vld [vmem:[%s4608_s6 + $0x88] sm:$0xff] }
 0x176   :  { %1776 = vmatpush.msrb.mxu3 %v1759_v54  ;;  %v1735_v54 = vld [vmem:[%s4608_s6 + $0x30] sm:$0xff] }
 0x177   :  { %1649 = vmatpush.msrb.mxu0 %v1624_v49  ;;  %1672 = vmatpush.msrb.mxu1 %v1640_v50  ;;  %v1738_v49 = vld [vmem:[%s4608_s6 + $0x48] sm:$0xff]  ;;  %v1897_v50 = vld [vmem:[%s4608_s6 + $0x1f8] sm:$0xff] }
 0x179   :  { %1650 = vmatpush.msrb.mxu0 %v1623_v51  ;;  %1673 = vmatpush.msrb.mxu1 %v1639_v52  ;;  %v1736_v52 = vld [vmem:[%s4608_s6 + $0x38] sm:$0xff] }
 0x17b   :  { %1651 = vmatpush.msrb.mxu0 %v1622_v55  ;;  %1674 = vmatpush.msrb.mxu1 %v1638_v56 }
 0x17d   :  { %1652 = vmatpush.msrb.mxu0 %v1621_v58  ;;  %1675 = vmatpush.msrb.mxu1 %v1637_v59  ;;  %v1734_v58 = vld [vmem:[%s4608_s6 + $0x28] sm:$0xff]  ;;  %v1893_v59 = vld [vmem:[%s4608_s6 + $0x1d8] sm:$0xff] }
 0x17f   :  { %1653 = vmatpush.msrb.mxu0 %v1620_v60  ;;  %1676 = vmatpush.msrb.mxu1 %v1636_v61 }
 0x180   :  { %2838 = vmatmul.msk.f32.vlgmr.msrb.gmra.mxu2 %vm1695_vm9, %v1691_v63  ;;  %v1757_v63 = vld [vmem:[%s4608_s6 + $0xe0] sm:$0xff] }
 0x181   :  { %1654 = vmatpush.msrb.mxu0 %v1619_v0  ;;  %1677 = vmatpush.msrb.mxu1 %v1635_v1  ;;  %v1732_v1 = vld [vmem:[%s4608_s6 + $0x18] sm:$0xff] }
 0x182   :  { %1777 = vmatpush.msrb.mxu3 %v1757_v63 }
 0x183   :  { %1655 = vmatpush.msrb.mxu0 %v1618_v2  ;;  %1678 = vmatpush.msrb.mxu1 %v1634_v3  ;;  %v1891_v2 = vld [vmem:[%s4608_s6 + $0x1c8] sm:$0xff]  ;;  %v1755_v3 = vld [vmem:[%s4608_s6 + $0xd0] sm:$0xff] }
 0x184   :  { %1778 = vmatpush.msrb.mxu3 %v1755_v3 }
 0x185   :  { %1656 = vmatpush.msrb.mxu0 %v1617_v4  ;;  %1679 = vmatpush.msrb.mxu1 %v1633_v5  ;;  %v1730_v4 = vld [vmem:[%s4608_s6 + $0x8] sm:$0xff]  ;;  %v1896_v5 = vld [vmem:[%s4608_s6 + $0x1f0] sm:$0xff] }
 0x187   :  { %1657 = vmatpush.msrb.mxu0 %v1616_v6  ;;  %1680 = vmatpush.msrb.mxu1 %v1632_v7  ;;  %v1889_v6 = vld [vmem:[%s4608_s6 + $0x1b8] sm:$0xff] }
 0x188   :  { %2839 = vmatmul.msk.f32.gmra.mxu2 %vm1695_vm9, %v1692_v8 }
 0x189   :  { %1658 = vmatpush.msrb.mxu0 %v1615_v11  ;;  %1681 = vmatpush.msrb.mxu1 %v1631_v12  ;;  %v1753_v11 = vld [vmem:[%s4608_s6 + $0xc0] sm:$0xff] }
 0x18a   :  { %v190_v17 = vpop.f32.mrf.mxu0  ;;  %v213_v18 = vpop.f32.mrf.mxu1  ;;  %v1894_v12 = vld [vmem:[%s4608_s6 + $0x1e0] sm:$0xff]  ;;  %1779 = vmatpush.msrb.mxu3 %v1753_v11  ;;  %v1867_v11 = vld [vmem:[%s4608_s6 + $0x108] sm:$0xff] }
 0x18b   :  { %1659 = vmatpush.msrb.mxu0 %v1614_v14  ;;  %1682 = vmatpush.msrb.mxu1 %v1630_v57  ;;  %v214_v19 = vadd.f32 %v213_v18, %v190_v17  ;;  %v1887_v14 = vld [vmem:[%s4608_s6 + $0x1a8] sm:$0xff]  ;;  %v1892_v18 = vld [vmem:[%s4608_s6 + $0x1d0] sm:$0xff] }
 0x18d   :  { %1660 = vmatpush.msrb.mxu0 %v1613_v15  ;;  %1683 = vmatpush.msrb.mxu1 %v1629_v62  ;;  %265 = vst [vmem:[#allocation7] sm:$0xff] %v214_v19  ;;  %v1751_v15 = vld [vmem:[%s4608_s6 + $0xb0] sm:$0xff]  ;;  %v1885_v19 = vld [vmem:[%s4608_s6 + $0x198] sm:$0xff] }
 0x18e   :  { %1661 = vmatmul.f32.vlgmr.msrb.gmra.mxu0 %v3538_v9  ;;  %1684 = vmatmul.f32.vlgmr.msrb.gmra.mxu1 %v3541_v10 }
 0x18f   :  { %1851 = vmatpush.msra.mxu0 %v1744_v33  ;;  %1898 = vmatpush.msra.mxu1 %v1896_v5  ;;  %v1879_v33 = vld [vmem:[%s4608_s6 + $0x168] sm:$0xff] }
 0x190   :  { %1780 = vmatpush.msrb.mxu3 %v1751_v15  ;;  %v1975_v5 = vld [vmem:[%s4609_s7 + $0x88] sm:$0xff]  ;;  %v1729_v15 = vld [vmem:[%s4608_s6] sm:$0xff] }
 0x191   :  { %v236_v20 = vpop.f32.mrf.mxu2  ;;  %v259_v21 = vpop.f32.mrf.mxu3  ;;  %1852 = vmatpush.msra.mxu0 %v1742_v35  ;;  %1899 = vmatpush.msra.mxu1 %v1894_v12  ;;  %v1741_v35 = vld [vmem:[%s4608_s6 + $0x60] sm:$0xff] }
 0x192   :  { %v260_v22 = vadd.f32 %v259_v21, %v236_v20  ;;  %v193_v23 = vpop.f32.mrf.mxu0  ;;  %v216_v24 = vpop.f32.mrf.mxu1 }
 0x193   :  { %v217_v27 = vadd.f32 %v216_v24, %v193_v23  ;;  %1853 = vmatpush.msra.mxu0 %v1740_v46  ;;  %1900 = vmatpush.msra.mxu1 %v1892_v18  ;;  %v1890_v24 = vld [vmem:[%s4608_s6 + $0x1c0] sm:$0xff]  ;;  %v1875_v46 = vld [vmem:[%s4608_s6 + $0x148] sm:$0xff] }
 0x194   :  { %266 = vst [vmem:[#allocation7 + $0x8] sm:$0xff] %v260_v22  ;;  %v1749_v22 = vld [vmem:[%s4608_s6 + $0xa0] sm:$0xff] }
 0x195   :  { %267 = vst [vmem:[#allocation7 + $0x10] sm:$0xff] %v217_v27  ;;  %1854 = vmatpush.msra.mxu0 %v1738_v49  ;;  %1781 = vmatpush.msrb.mxu3 %v1749_v22  ;;  %v1883_v27 = vld [vmem:[%s4608_s6 + $0x188] sm:$0xff]  ;;  %v1870_v18 = vld [vmem:[%s4608_s6 + $0x120] sm:$0xff] }
 0x196   :  { %1664 = vmatmul.f32.gmra.mxu0 %v3581_v25  ;;  %1687 = vmatmul.f32.gmra.mxu1 %v3584_v26  ;;  %v1760_v25 = vld [vmem:[%s4608_s6 + $0xf8] sm:$0xff]  ;;  %v1758_v26 = vld [vmem:[%s4608_s6 + $0xe8] sm:$0xff] }
 0x197   :  { %1799 = vmatpush.msra.mxu2 %v1760_v25  ;;  %1855 = vmatpush.msra.mxu0 %v1736_v52  ;;  %v1743_v25 = vld [vmem:[%s4608_s6 + $0x70] sm:$0xff] }
 0x198   :  { %1901 = vmatpush.msra.mxu1 %v1890_v24  ;;  %v1868_v24 = vld [vmem:[%s4608_s6 + $0x110] sm:$0xff] }
 0x199   :  { %v239_v28 = vpop.f32.mrf.mxu2  ;;  %v262_v9 = vpop.f32.mrf.mxu3  ;;  %1800 = vmatpush.msra.mxu2 %v1758_v26  ;;  %1856 = vmatpush.msra.mxu0 %v1734_v58  ;;  %v1886_v26 = vld [vmem:[%s4608_s6 + $0x1a0] sm:$0xff] }
 0x19a   :  { %v263_v29 = vadd.f32 %v262_v9, %v239_v28  ;;  %v1398_v10 = vpop.f32.mrf.mxu0  ;;  %v1412_v13 = vpop.f32.mrf.mxu1  ;;  %v1747_v9 = vld [vmem:[%s4608_s6 + $0x90] sm:$0xff]  ;;  %v1878_v58 = vld [vmem:[%s4608_s6 + $0x160] sm:$0xff] }
 0x19b   :  { %1801 = vmatpush.msra.mxu2 %v1756_v34  ;;  %v1413_v40 = vadd.f32 %v1412_v13, %v1398_v10  ;;  %1857 = vmatpush.msra.mxu0 %v1732_v1  ;;  %v1888_v10 = vld [vmem:[%s4608_s6 + $0x1b0] sm:$0xff]  ;;  %v1881_v13 = vld [vmem:[%s4608_s6 + $0x178] sm:$0xff] }
 0x19c   :  { %268 = vst [vmem:[#allocation7 + $0x18] sm:$0xff] %v263_v29  ;;  %v1989_v29 = vld [vmem:[%s4609_s7 + $0xf8] sm:$0xff]  ;;  %1782 = vmatpush.msrb.mxu3 %v1747_v9  ;;  %1902 = vmatpush.msra.mxu1 %v1888_v10  ;;  %v1876_v1 = vld [vmem:[%s4608_s6 + $0x150] sm:$0xff]  ;;  %v1866_v10 = vld [vmem:[%s4608_s6 + $0x100] sm:$0xff] }
 0x19d   :  { %1802 = vmatpush.msra.mxu2 %v1754_v36  ;;  %1858 = vmatpush.msra.mxu0 %v1730_v4  ;;  %v1985_v34 = vld [vmem:[%s4609_s7 + $0xd8] sm:$0xff] }
 0x19e   :  { %1903 = vmatpush.msra.mxu1 %v1886_v26  ;;  %v1969_v26 = vld [vmem:[%s4609_s7 + $0x58] sm:$0xff] }
 0x19f   :  { %1803 = vmatpush.msra.mxu2 %v1752_v38  ;;  %2021 = vmatpush.msrb.mxu0 %v1989_v29  ;;  %v1884_v38 = vld [vmem:[%s4608_s6 + $0x190] sm:$0xff]  ;;  %v1973_v29 = vld [vmem:[%s4609_s7 + $0x78] sm:$0xff] }
 0x1a0   :  { %1904 = vmatpush.msra.mxu1 %v1884_v38  ;;  %2241 = dma.vmem_to_hbm [thread:$0]  %s2234_s16, 512, %s2236_s1, [#allocation8], %s3137_s17, %s3137_s17, %s3138_s18  }
 0x1a1   :  { %v1426_v16 = vpop.f32.mrf.mxu2  ;;  %v1440_v30 = vpop.f32.mrf.mxu3  ;;  %1804 = vmatpush.msra.mxu2 %v1750_v42  ;;  %v1739_v42 = vld [vmem:[%s4608_s6 + $0x50] sm:$0xff] }
 0x1a2   :  { %v1400_v31 = vpop.f32.mrf.mxu0  ;;  %v1414_v32 = vpop.f32.mrf.mxu1  ;;  %v1427_v45 = vadd.f32 %v1426_v16, %v1413_v40  ;;  %v1745_v16 = vld [vmem:[%s4608_s6 + $0x80] sm:$0xff] }
 0x1a3   :  { %1805 = vmatpush.msra.mxu2 %v1748_v43  ;;  %v1415_v60 = vadd.f32 %v1414_v32, %v1400_v31  ;;  %v1987_v31 = vld [vmem:[%s4609_s7 + $0xe8] sm:$0xff]  ;;  %1783 = vmatpush.msrb.mxu3 %v1745_v16  ;;  %v4296_v16 = vld [vmem:[%s4609_s7 + $0x1f0] sm:$0xff] }
 0x1a4   :  { %v1441_v51 = vadd.f32 %v1440_v30, %v1427_v45  ;;  %2022 = vmatpush.msrb.mxu0 %v1987_v31  ;;  %v1882_v45 = vld [vmem:[%s4608_s6 + $0x180] sm:$0xff] }
 0x1a5   :  { %1806 = vmatpush.msra.mxu2 %v1746_v47  ;;  %1828 = vmatpush.msra.mxu3 %v1743_v25  ;;  %v1981_v47 = vld [vmem:[%s4609_s7 + $0xb8] sm:$0xff]  ;;  %v4307_v31 = vld [vmem:[%s4609_s7 + $0x1e0] sm:$0xff] }
 0x1a6   :  { %2023 = vmatpush.msrb.mxu0 %v1985_v34  ;;  %1905 = vmatpush.msra.mxu1 %v1882_v45 }
 0x1a7   :  { %1921 = vmatpush.msrb.mxu2 %v1897_v50  ;;  %1829 = vmatpush.msra.mxu3 %v1741_v35  ;;  %v1880_v50 = vld [vmem:[%s4608_s6 + $0x170] sm:$0xff]  ;;  %v1967_v35 = vld [vmem:[%s4609_s7 + $0x48] sm:$0xff] }
 0x1a8   :  { %1906 = vmatpush.msra.mxu1 %v1880_v50 }
 0x1a9   :  { %v1428_v37 = vpop.f32.mrf.mxu2  ;;  %v4087_v39 = vpop.f32.mrf.mxu3  ;;  %1922 = vmatpush.msrb.mxu2 %v1895_v53  ;;  %1830 = vmatpush.msra.mxu3 %v1739_v42  ;;  %v1979_v53 = vld [vmem:[%s4609_s7 + $0xa8] sm:$0xff]  ;;  %v4347_v42 = vld [vmem:[%s4609_s7 + $0x1a0] sm:$0xff] }
 0x1aa   :  { %v1429_v7 = vadd.f32 %v1428_v37, %v1415_v60  ;;  %1907 = vmatpush.msra.mxu1 %v1878_v58  ;;  %v2111_v58 = vld [vmem:[%s4609_s7 + $0x1e8] sm:$0xff] }
 0x1ab   :  { %v1454_v41 = vpop.f32.mrf.mxu0  ;;  %v1468_v44 = vpop.f32.mrf.mxu1  ;;  %1923 = vmatpush.msrb.mxu2 %v1893_v59  ;;  %v1871_v59 = vld [vmem:[%s4608_s6 + $0x128] sm:$0xff] }
 0x1ac   :  { %v1455_v61 = vadd.f32 %v1454_v41, %v1441_v51  ;;  %v1443_v20 = vadd.f32 %v4087_v39, %v1429_v7  ;;  %v1877_v39 = vld [vmem:[%s4608_s6 + $0x158] sm:$0xff]  ;;  %v1983_v41 = vld [vmem:[%s4609_s7 + $0xc8] sm:$0xff]  ;;  %1908 = vmatpush.msra.mxu1 %v1876_v1  ;;  %v1731_v7 = vld [vmem:[%s4608_s6 + $0x10] sm:$0xff] }
 0x1ad   :  { %1924 = vmatpush.msrb.mxu2 %v1891_v2  ;;  %2024 = vmatpush.msrb.mxu0 %v1983_v41  ;;  %v1873_v51 = vld [vmem:[%s4608_s6 + $0x138] sm:$0xff]  ;;  %v1963_v41 = vld [vmem:[%s4609_s7 + $0x28] sm:$0xff] }
 0x1ae   :  { %v1469_v8 = vadd.f32 %v1468_v44, %v1455_v61  ;;  %v1977_v61 = vld [vmem:[%s4609_s7 + $0x98] sm:$0xff]  ;;  %v2107_v1 = vld [vmem:[%s4609_s7 + $0x1c8] sm:$0xff] }
 0x1af   :  { %1925 = vmatpush.msrb.mxu2 %v1889_v6  ;;  %2025 = vmatpush.msrb.mxu0 %v1981_v47  ;;  %v1869_v2 = vld [vmem:[%s4608_s6 + $0x118] sm:$0xff]  ;;  %v4367_v47 = vld [vmem:[%s4609_s7 + $0x180] sm:$0xff] }
 0x1b1   :  { %1926 = vmatpush.msrb.mxu2 %v1887_v14  ;;  %2026 = vmatpush.msrb.mxu0 %v1979_v53 }
 0x1b3   :  { %v1456_v56 = vpop.f32.mrf.mxu0  ;;  %v1470_v0 = vpop.f32.mrf.mxu1  ;;  %1927 = vmatpush.msrb.mxu2 %v1885_v19  ;;  %2027 = vmatpush.msrb.mxu0 %v1977_v61 }
 0x1b4   :  { %v1482_v48 = vpop.f32.mrf.mxu2  ;;  %v1496_v55 = vpop.f32.mrf.mxu3  ;;  %v1457_v28 = vadd.f32 %v1456_v56, %v1443_v20 }
 0x1b5   :  { %v1483_v21 = vadd.f32 %v1482_v48, %v1469_v8  ;;  %1928 = vmatpush.msrb.mxu2 %v1883_v27  ;;  %v1737_v48 = vld [vmem:[%s4608_s6 + $0x40] sm:$0xff]  ;;  %2028 = vmatpush.msrb.mxu0 %v1975_v5 }
 0x1b6   :  { %v1471_v36 = vadd.f32 %v1470_v0, %v1457_v28  ;;  %1831 = vmatpush.msra.mxu3 %v1737_v48  ;;  %v1733_v0 = vld [vmem:[%s4608_s6 + $0x20] sm:$0xff]  ;;  %v4374_v48 = vld [vmem:[%s4609_s7 + $0x170] sm:$0xff] }
 0x1b7   :  { %v1497_v30 = vadd.f32 %v1496_v55, %v1483_v21  ;;  %1929 = vmatpush.msrb.mxu2 %v1881_v13  ;;  %v1874_v8 = vld [vmem:[%s4608_s6 + $0x140] sm:$0xff] }
 0x1b8   :  { %1832 = vmatpush.msra.mxu3 %v1735_v54  ;;  %1909 = vmatpush.msra.mxu1 %v1874_v8  ;;  %v2113_v54 = vld [vmem:[%s4609_s7 + $0x1f8] sm:$0xff]  ;;  %v4450_v8 = vld [vmem:[%s4609_s7 + $0x110] sm:$0xff] }
 0x1b9   :  { %1930 = vmatpush.msrb.mxu2 %v1879_v33  ;;  %v4316_v33 = vld [vmem:[%s4609_s7 + $0x1d0] sm:$0xff] }
 0x1ba   :  { %1833 = vmatpush.msra.mxu3 %v1733_v0  ;;  %v1984_v0 = vld [vmem:[%s4609_s7 + $0xd0] sm:$0xff] }
 0x1bb   :  { %1931 = vmatpush.msrb.mxu2 %v1877_v39  ;;  %v1965_v39 = vld [vmem:[%s4609_s7 + $0x38] sm:$0xff] }
 0x1bc   :  { %v1484_v57 = vpop.f32.mrf.mxu2  ;;  %v4155_v17 = vpop.f32.mrf.mxu3  ;;  %1834 = vmatpush.msra.mxu3 %v1731_v7  ;;  %v2105_v7 = vld [vmem:[%s4609_s7 + $0x1b8] sm:$0xff] }
 0x1bd   :  { %v1485_v43 = vadd.f32 %v1484_v57, %v1471_v36  ;;  %1932 = vmatpush.msrb.mxu2 %v1875_v46  ;;  %v1959_v46 = vld [vmem:[%s4609_s7 + $0x8] sm:$0xff] }
 0x1be   :  { %1835 = vmatpush.msra.mxu3 %v1729_v15  ;;  %v2101_v15 = vld [vmem:[%s4609_s7 + $0x198] sm:$0xff] }
 0x1bf   :  { %v1499_v55 = vadd.f32 %v4155_v17, %v1485_v43  ;;  %1933 = vmatpush.msrb.mxu2 %v1873_v51  ;;  %v1872_v17 = vld [vmem:[%s4608_s6 + $0x130] sm:$0xff]  ;;  %v1961_v43 = vld [vmem:[%s4609_s7 + $0x18] sm:$0xff]  ;;  %s3141_s6 = smov [#allocation6]  }
 0x1c0   :  { %1910 = vmatpush.msra.mxu1 %v1872_v17  ;;  %v2099_v17 = vld [vmem:[%s4609_s7 + $0x188] sm:$0xff]  ;;  %s2220_s0 = sshll.u32 %s3141_s6, 4  ;;  %s2221_s0 = int_to_ptr.vmem [resolvable:$true] %s2220_s0 }
 0x1c1   :  { %1934 = vmatpush.msrb.mxu2 %v1871_v59  ;;  %v1986_v59 = vld [vmem:[%s4609_s7 + $0xe0] sm:$0xff] }
 0x1c2   :  { %1911 = vmatpush.msra.mxu1 %v1870_v18  ;;  %v1974_v18 = vld [vmem:[%s4609_s7 + $0x80] sm:$0xff] }
 0x1c3   :  { %1935 = vmatpush.msrb.mxu2 %v1869_v2  ;;  %v4436_v2 = vld [vmem:[%s4609_s7 + $0x120] sm:$0xff] }
 0x1c4   :  { %1912 = vmatpush.msra.mxu1 %v1868_v24  ;;  %v1968_v24 = vld [vmem:[%s4609_s7 + $0x50] sm:$0xff] }
 0x1c5   :  { %1936 = vmatpush.msrb.mxu2 %v1867_v11  ;;  %v1980_v11 = vld [vmem:[%s4609_s7 + $0xb0] sm:$0xff] }
 0x1c6   :  { %1913 = vmatpush.msra.mxu1 %v1866_v10  ;;  %v1964_v10 = vld [vmem:[%s4609_s7 + $0x30] sm:$0xff] }
 0x1c8   :  { %2114 = vmatpush.msrb.mxu1 %v4296_v16 }
 0x1ca   :  { %2115 = vmatpush.msrb.mxu1 %v4307_v31 }
 0x1cb   :  { %v1510_v62 = vpop.f32.mrf.mxu0  ;;  %v1524_v23 = vpop.f32.mrf.mxu1 }
 0x1cc   :  { %v1511_v37 = vadd.f32 %v1510_v62, %v1497_v30  ;;  %v1971_v30 = vld [vmem:[%s4609_s7 + $0x68] sm:$0xff]  ;;  %2116 = vmatpush.msrb.mxu1 %v4316_v33 }
 0x1ce   :  { %v1525_v49 = vadd.f32 %v1524_v23, %v1511_v37  ;;  %v4325_v37 = vld [vmem:[%s4609_s7 + $0x1c0] sm:$0xff] }
 0x1cf   :  { %2117 = vmatpush.msrb.mxu1 %v4325_v37 }
 0x1d3   :  { %v1512_v44 = vpop.f32.mrf.mxu0  ;;  %v1526_v52 = vpop.f32.mrf.mxu1 }
 0x1d4   :  { %v1538_v32 = vpop.f32.mrf.mxu2  ;;  %v1552_v40 = vpop.f32.mrf.mxu3  ;;  %v1513_v60 = vadd.f32 %v1512_v44, %v1499_v55  ;;  %v4356_v44 = vld [vmem:[%s4609_s7 + $0x190] sm:$0xff] }
 0x1d5   :  { %v1539_v56 = vadd.f32 %v1538_v32, %v1525_v49  ;;  %v4380_v49 = vld [vmem:[%s4609_s7 + $0x160] sm:$0xff]  ;;  %v1988_v55 = vld [vmem:[%s4609_s7 + $0xf0] sm:$0xff] }
 0x1d6   :  { %v1527_v12 = vadd.f32 %v1526_v52, %v1513_v60  ;;  %v4386_v52 = vld [vmem:[%s4609_s7 + $0x150] sm:$0xff]  ;;  %v2109_v60 = vld [vmem:[%s4609_s7 + $0x1d8] sm:$0xff] }
 0x1d7   :  { %v1553_v3 = vadd.f32 %v1552_v40, %v1539_v56  ;;  %v4336_v40 = vld [vmem:[%s4609_s7 + $0x1b0] sm:$0xff]  ;;  %v4400_v56 = vld [vmem:[%s4609_s7 + $0x140] sm:$0xff] }
 0x1d8   :  { %2118 = vmatpush.msrb.mxu1 %v4336_v40 }
 0x1da   :  { %2119 = vmatpush.msrb.mxu1 %v4347_v42 }
 0x1dc   :  { %v1540_v63 = vpop.f32.mrf.mxu2  ;;  %v1554_v6 = vpop.f32.mrf.mxu3  ;;  %2120 = vmatpush.msrb.mxu1 %v4356_v44 }
 0x1dd   :  { %v1541_v62 = vadd.f32 %v1540_v63, %v1527_v12  ;;  %v4423_v63 = vld [vmem:[%s4609_s7 + $0x130] sm:$0xff]  ;;  %v2103_v12 = vld [vmem:[%s4609_s7 + $0x1a8] sm:$0xff] }
 0x1de   :  { %2121 = vmatpush.msrb.mxu1 %v4367_v47 }
 0x1df   :  { %v1555_v21 = vadd.f32 %v1554_v6, %v1541_v62  ;;  %v1982_v6 = vld [vmem:[%s4609_s7 + $0xc0] sm:$0xff]  ;;  %v1976_v62 = vld [vmem:[%s4609_s7 + $0x90] sm:$0xff] }
 0x1e0   :  { %2122 = vmatpush.msrb.mxu1 %v4374_v48 }
 0x1e2   :  { %2123 = vmatpush.msrb.mxu1 %v4380_v49 }
 0x1e4   :  { %2124 = vmatpush.msrb.mxu1 %v4386_v52 }
 0x1e6   :  { %2125 = vmatpush.msrb.mxu1 %v4400_v56 }
 0x1e8   :  { %2126 = vmatpush.msrb.mxu1 %v4423_v63 }
 0x1ea   :  { %2127 = vmatpush.msrb.mxu1 %v4436_v2 }
 0x1eb   :  { %v1566_v4 = vpop.f32.mrf.mxu0  ;;  %v1580_v57 = vpop.f32.mrf.mxu1 }
 0x1ec   :  { %v1567_v14 = vadd.f32 %v1566_v4, %v1553_v3  ;;  %2128 = vmatpush.msrb.mxu1 %v4450_v8 }
 0x1ee   :  { %v1581_v19 = vadd.f32 %v1580_v57, %v1567_v14  ;;  %v4467_v14 = vld [vmem:[%s4609_s7 + $0x100] sm:$0xff] }
 0x1ef   :  { %v1978_v57 = vld [vmem:[%s4609_s7 + $0xa0] sm:$0xff]  ;;  %2129 = vmatpush.msrb.mxu1 %v4467_v14 }
 0x1f3   :  { %v1594_v20 = vpop.f32.mrf.mxu2  ;;  %v1568_v23 = vpop.f32.mrf.mxu0 }
 0x1f4   :  { %v1595_v22 = vadd.f32 %v1594_v20, %v1581_v19  ;;  %v1608_v27 = vpop.f32.mrf.mxu3  ;;  %v1569_v28 = vadd.f32 %v1568_v23, %v1555_v21  ;;  %v1582_v13 = vpop.f32.mrf.mxu1  ;;  %v2097_v19 = vld [vmem:[%s4609_s7 + $0x178] sm:$0xff]  ;;  %v1972_v20 = vld [vmem:[%s4609_s7 + $0x70] sm:$0xff]  ;;  %v2095_v21 = vld [vmem:[%s4609_s7 + $0x168] sm:$0xff] }
 0x1f5   :  { %v2093_v23 = vld [vmem:[%s4609_s7 + $0x158] sm:$0xff] }
 0x1f6   :  { %v4285_v9 = vadd.f32 %v1608_v27, %v1595_v22  ;;  %v1583_v25 = vadd.f32 %v1582_v13, %v1569_v28  ;;  %v1970_v22 = vld [vmem:[%s4609_s7 + $0x60] sm:$0xff]  ;;  %v2091_v27 = vld [vmem:[%s4609_s7 + $0x148] sm:$0xff] }
 0x1f7   :  { %v1966_v28 = vld [vmem:[%s4609_s7 + $0x40] sm:$0xff]  ;;  %v2087_v13 = vld [vmem:[%s4609_s7 + $0x128] sm:$0xff] }
 0x1f8   :  { %2846 = vmatmul.msk.f32.vlgmr.msra.gmra.mxu0 %vm1761_vm10, %v4285_v9 }
 0x1f9   :  { %2067 = vmatpush.msra.mxu0 %v1973_v29  ;;  %v2089_v29 = vld [vmem:[%s4609_s7 + $0x138] sm:$0xff] }
 0x1fb   :  { %v1596_v32 = vpop.f32.mrf.mxu2  ;;  %2068 = vmatpush.msra.mxu0 %v1971_v30  ;;  %v1962_v30 = vld [vmem:[%s4609_s7 + $0x20] sm:$0xff] }
 0x1fc   :  { %v1597_v34 = vadd.f32 %v1596_v32, %v1583_v25  ;;  %v1610_v36 = vpop.f32.mrf.mxu3  ;;  %v2085_v25 = vld [vmem:[%s4609_s7 + $0x118] sm:$0xff]  ;;  %v2083_v32 = vld [vmem:[%s4609_s7 + $0x108] sm:$0xff] }
 0x1fd   :  { %2069 = vmatpush.msra.mxu0 %v1969_v26  ;;  %v1960_v26 = vld [vmem:[%s4609_s7 + $0x10] sm:$0xff] }
 0x1fe   :  { %v4327_v38 = vadd.f32 %v1610_v36, %v1597_v34  ;;  %v1958_v34 = vld [vmem:[%s4609_s7] sm:$0xff] }
 0x1ff   :  { %2070 = vmatpush.msra.mxu0 %v1967_v35 }
 0x200   :  { %2847 = vmatmul.msk.f32.gmra.mxu0 %vm1761_vm10, %v4327_v38 }
 0x201   :  { %2071 = vmatpush.msra.mxu0 %v1965_v39 }
 0x203   :  { %2072 = vmatpush.msra.mxu0 %v1963_v41  ;;  %v4358_v45 = vpop.f32.mrf.mxu2 }
 0x204   :  { %1914 = vmatmul.f32.vlgmr.msra.gmra.mxu1 %v4358_v45 }
 0x205   :  { %2073 = vmatpush.msra.mxu0 %v1961_v43 }
 0x207   :  { %2074 = vmatpush.msra.mxu0 %v1959_v46 }
 0x20b   :  { %v1662_v50 = vpop.f32.mrf.mxu0  ;;  %v1685_v51 = vpop.f32.mrf.mxu1 }
 0x20c   :  { %v4388_v53 = vadd.f32 %v1685_v51, %v1662_v50  ;;  %v4417_v61 = vpop.f32.mrf.mxu2 }
 0x20d   :  { %1917 = vmatmul.f32.gmra.mxu1 %v4417_v61 }
 0x20e   :  { %2840 = vmatmul.msk.f32.vlgmr.msrb.gmra.mxu3 %vm1761_vm10, %v4388_v53  ;;  %2842 = vmatmul.msk.f32.vlgmr.msra.gmra.mxu2 %vm1761_vm10, %v4388_v53 }
 0x20f   :  { %2850 = vmatmul.msk.f32.vlgmr.msrb.gmra.mxu0 %vm1761_vm10, %v4388_v53  ;;  %2137 = vmatpush.msra.mxu2 %v2113_v54 }
 0x210   :  { %1998 = vmatpush.msrb.mxu3 %v1988_v55 }
 0x211   :  { %2138 = vmatpush.msra.mxu2 %v2111_v58 }
 0x212   :  { %1999 = vmatpush.msrb.mxu3 %v1986_v59 }
 0x213   :  { %v1665_v3 = vpop.f32.mrf.mxu0  ;;  %v1688_v4 = vpop.f32.mrf.mxu1  ;;  %2139 = vmatpush.msra.mxu2 %v2109_v60 }
 0x214   :  { %v4438_v5 = vadd.f32 %v1688_v4, %v1665_v3  ;;  %2000 = vmatpush.msrb.mxu3 %v1984_v0 }
 0x215   :  { %2140 = vmatpush.msra.mxu2 %v2107_v1  ;;  %2130 = vmatmul.f32.vlgmr.msrb.gmra.mxu1 %v4358_v45  ;;  %v2164_v1 = vld [vmem:[%s4611_s9] sm:$0x3]  ;;  %s3140_s9 = smov [#allocation4]  }
 0x216   :  { %2841 = vmatmul.msk.f32.gmra.mxu3 %vm1761_vm10, %v4438_v5  ;;  %2843 = vmatmul.msk.f32.gmra.mxu2 %vm1761_vm10, %v4438_v5  ;;  %s2207_s11 = sshll.u32 %s3140_s9, 4  ;;  %s2208_s11 = int_to_ptr.vmem [resolvable:$true] %s2207_s11 }
 0x217   :  { %2851 = vmatmul.msk.f32.gmra.mxu0 %vm1761_vm10, %v4438_v5  ;;  %2001 = vmatpush.msrb.mxu3 %v1982_v6  ;;  %v2167_v6 = vperm.slane %v2164_v1, 1 }
 0x218   :  { %2141 = vmatpush.msra.mxu2 %v2105_v7 }
 0x219   :  { %2002 = vmatpush.msrb.mxu3 %v1980_v11 }
 0x21a   :  { %2142 = vmatpush.msra.mxu2 %v2103_v12 }
 0x21b   :  { %2003 = vmatpush.msrb.mxu3 %v1978_v57 }
 0x21c   :  { %2143 = vmatpush.msra.mxu2 %v2101_v15 }
 0x21d   :  { %2004 = vmatpush.msrb.mxu3 %v1976_v62 }
 0x21e   :  { %2144 = vmatpush.msra.mxu2 %v2099_v17  ;;  %2844 = vmatmul.msk.f32.vlgmr.msra.gmra.mxu3 %vm1761_vm10, %v4285_v9 }
 0x21f   :  { %1937 = vmatmul.f32.vlgmr.msrb.gmra.mxu2 %v4358_v45  ;;  %2854 = vmatmul.msk.f32.vlgmr.msra.gmra.mxu0 %vm1761_vm10, %v4285_v9 }
 0x220   :  { %2005 = vmatpush.msrb.mxu3 %v1974_v18  ;;  %2145 = vmatpush.msra.mxu2 %v2097_v19 }
 0x222   :  { %2044 = vmatpush.msra.mxu3 %v1972_v20  ;;  %2146 = vmatpush.msra.mxu2 %v2095_v21 }
 0x224   :  { %2045 = vmatpush.msra.mxu3 %v1970_v22  ;;  %2147 = vmatpush.msra.mxu2 %v2093_v23  ;;  %v2166_v22 = vperm.slane %v2164_v1, 0 }
 0x226   :  { %2046 = vmatpush.msra.mxu3 %v1968_v24  ;;  %2148 = vmatpush.msra.mxu2 %v2091_v27 }
 0x227   :  { %2845 = vmatmul.msk.f32.gmra.mxu3 %vm1761_vm10, %v4327_v38  ;;  %1940 = vmatmul.f32.gmra.mxu2 %v4417_v61 }
 0x228   :  { %2047 = vmatpush.msra.mxu3 %v1966_v28  ;;  %2855 = vmatmul.msk.f32.gmra.mxu0 %vm1761_vm10, %v4327_v38 }
 0x229   :  { %2149 = vmatpush.msra.mxu2 %v2089_v29 }
 0x22a   :  { %2048 = vmatpush.msra.mxu3 %v1964_v10 }
 0x22b   :  { %2150 = vmatpush.msra.mxu2 %v2087_v13 }
 0x22c   :  { %2049 = vmatpush.msra.mxu3 %v1962_v30 }
 0x22d   :  { %2151 = vmatpush.msra.mxu2 %v2085_v25 }
 0x22e   :  { %2050 = vmatpush.msra.mxu3 %v1960_v26 }
 0x22f   :  { %2152 = vmatpush.msra.mxu2 %v2083_v32  ;;  %2848 = vmatmul.msk.f32.vlgmr.msrb.gmra.mxu3 %vm1761_vm10, %v4388_v53 }
 0x230   :  { %2051 = vmatpush.msra.mxu3 %v1958_v34  ;;  %2153 = vmatmul.f32.vlgmr.msra.gmra.mxu2 %v4358_v45 }
 0x232   :  { %3000 = vmatpush.msrb.mxu3 %v4296_v16 }
 0x234   :  { %3001 = vmatpush.msrb.mxu3 %v4307_v31 }
 0x236   :  { %3002 = vmatpush.msrb.mxu3 %v4316_v33 }
 0x237   :  { %2849 = vmatmul.msk.f32.gmra.mxu3 %vm1761_vm10, %v4438_v5 }
 0x238   :  { %3003 = vmatpush.msrb.mxu3 %v4325_v37  ;;  %2156 = vmatmul.f32.gmra.mxu2 %v4417_v61 }
 0x23a   :  { %3004 = vmatpush.msrb.mxu3 %v4336_v40 }
 0x23c   :  { %3005 = vmatpush.msrb.mxu3 %v4347_v42 }
 0x23e   :  { %3006 = vmatpush.msrb.mxu3 %v4356_v44 }
 0x23f   :  { %2852 = vmatmul.msk.f32.vlgmr.msra.gmra.mxu3 %vm1761_vm10, %v4285_v9 }
 0x240   :  { %3007 = vmatpush.msrb.mxu3 %v4367_v47 }
 0x242   :  { %3008 = vmatpush.msrb.mxu3 %v4374_v48 }
 0x244   :  { %3009 = vmatpush.msrb.mxu3 %v4380_v49 }
 0x246   :  { %3010 = vmatpush.msrb.mxu3 %v4386_v52 }
 0x247   :  { %2853 = vmatmul.msk.f32.gmra.mxu3 %vm1761_vm10, %v4327_v38  ;;  %v1948_v38 = vld [vmem:[%s4610_s8] sm:$0x3]  ;;  %s3139_s8 = smov [#allocation2]  }
 0x248   :  { %3011 = vmatpush.msrb.mxu3 %v4400_v56  ;;  %v1951_v42 = vperm.slane %v1948_v38, 1  ;;  %v1950_v46 = vperm.slane %v1948_v38, 0  ;;  %s2194_s14 = sshll.u32 %s3139_s8, 4  ;;  %s2195_s14 = int_to_ptr.vmem [resolvable:$true] %s2194_s14 }
 0x24a   :  { %3012 = vmatpush.msrb.mxu3 %v4423_v63 }
 0x24c   :  { %3013 = vmatpush.msrb.mxu3 %v4436_v2 }
 0x24e   :  { %3014 = vmatpush.msrb.mxu3 %v4450_v8 }
 0x250   :  { %3015 = vmatpush.msrb.mxu3 %v4467_v14 }
 0x251   :  { %2133 = vmatmul.f32.vlgmr.msrb.gmra.mxu3 %v4417_v61 }
 0x275   :  { %v1860_v9 = vpop.f32.mrf.mxu0 }
 0x27d   :  { %v1863_v16 = vpop.f32.mrf.mxu0 }
 0x281   :  { %v1915_v39 = vpop.f32.mrf.mxu1 }
 0x28a   :  { %v1918_v55 = vpop.f32.mrf.mxu1 }
 0x28c   :  { %v2030_v35 = vpop.f32.mrf.mxu0 }
 0x291   :  { %v1785_v31 = vpop.f32.mrf.mxu3  ;;  %v1808_v33 = vpop.f32.mrf.mxu2 }
 0x292   :  { %v1861_v40 = vadd.f32 %v1860_v9, %v1808_v33  ;;  %v2131_v23 = vpop.f32.mrf.mxu1 }
 0x294   :  { %v2033_v43 = vpop.f32.mrf.mxu0 }
 0x299   :  { %v1788_v36 = vpop.f32.mrf.mxu3  ;;  %v1811_v37 = vpop.f32.mrf.mxu2 }
 0x29a   :  { %v1864_v53 = vadd.f32 %v1863_v16, %v1811_v37 }
 0x29c   :  { %v2076_v60 = vpop.f32.mrf.mxu0 }
 0x29d   :  { %v2077_v4 = vadd.f32 %v2076_v60, %v2030_v35 }
 0x2a1   :  { %v1837_v41 = vpop.f32.mrf.mxu3 }
 0x2a2   :  { %v1838_v44 = vadd.f32 %v1837_v41, %v1785_v31  ;;  %v1938_v45 = vpop.f32.mrf.mxu2 }
 0x2a3   :  { %v1945_v47 = vadd.f32 %v1938_v45, %v1861_v40 }
 0x2a4   :  { %v1944_v48 = vadd.f32 %v1915_v39, %v1838_v44 }
 0x2a5   :  { %v1955_v49 = vadd.f32 %v1951_v42, %v1945_v47  ;;  %v2079_v12 = vpop.f32.mrf.mxu0 }
 0x2a6   :  { %v1954_v50 = vadd.f32 %v1950_v46, %v1944_v48  ;;  %v2080_v57 = vadd.f32 %v2079_v12, %v2033_v43 }
 0x2a7   :  { %v2175_v51 = vmax.f32 %v1955_v49, 0.0 }
 0x2a8   :  { %v2174_v52 = vmax.f32 %v1954_v50, 0.0 }
 0x2a9   :  { %2179 = vst [vmem:[#allocation2 + $0x8] sm:$0xff] %v2175_v51 }
 0x2aa   :  { %v1840_v54 = vpop.f32.mrf.mxu3  ;;  %2178 = vst [vmem:[#allocation2] sm:$0xff] %v2174_v52  ;;  %v1941_v58 = vpop.f32.mrf.mxu2 }
 0x2ab   :  { %v1841_v56 = vadd.f32 %v1840_v54, %v1788_v36  ;;  %v1947_v59 = vadd.f32 %v1941_v58, %v1864_v53 }
 0x2ad   :  { %v1946_v61 = vadd.f32 %v1918_v55, %v1841_v56  ;;  %v1957_v63 = vadd.f32 %v1951_v42, %v1947_v59 }
 0x2af   :  { %v1956_v0 = vadd.f32 %v1950_v46, %v1946_v61  ;;  %v2177_v2 = vmax.f32 %v1957_v63, 0.0 }
 0x2b1   :  { %v2176_v3 = vmax.f32 %v1956_v0, 0.0  ;;  %2181 = vst [vmem:[#allocation2 + $0x18] sm:$0xff] %v2177_v2 }
 0x2b2   :  { %v2007_v5 = vpop.f32.mrf.mxu3 }
 0x2b3   :  { %2180 = vst [vmem:[#allocation2 + $0x10] sm:$0xff] %v2176_v3  ;;  %v2154_v7 = vpop.f32.mrf.mxu2 }
 0x2b4   :  { %v2161_v8 = vadd.f32 %v2154_v7, %v2077_v4  ;;  %2202 = dma.vmem_to_hbm [thread:$0]  %s2195_s14, 512, %s2197_s5, [#allocation3], %s3137_s17, %s3137_s17, %s3138_s18  }
 0x2b6   :  { %v2171_v11 = vadd.f32 %v2167_v6, %v2161_v8 }
 0x2b8   :  { %v2183_v14 = vmax.f32 %v2171_v11, 0.0 }
 0x2ba   :  { %2187 = vst [vmem:[#allocation4 + $0x8] sm:$0xff] %v2183_v14  ;;  %v2010_v15 = vpop.f32.mrf.mxu3 }
 0x2bb   :  { %v2157_v62 = vpop.f32.mrf.mxu2 }
 0x2bc   :  { %v2163_v17 = vadd.f32 %v2157_v62, %v2080_v57 }
 0x2be   :  { %v2173_v18 = vadd.f32 %v2167_v6, %v2163_v17 }
 0x2c0   :  { %v2185_v19 = vmax.f32 %v2173_v18, 0.0 }
 0x2c2   :  { %2189 = vst [vmem:[#allocation4 + $0x18] sm:$0xff] %v2185_v19  ;;  %v2053_v20 = vpop.f32.mrf.mxu3 }
 0x2c3   :  { %v2054_v21 = vadd.f32 %v2053_v20, %v2007_v5 }
 0x2c5   :  { %v2160_v24 = vadd.f32 %v2131_v23, %v2054_v21 }
 0x2c7   :  { %v2170_v27 = vadd.f32 %v2166_v22, %v2160_v24 }
 0x2c9   :  { %v2182_v28 = vmax.f32 %v2170_v27, 0.0 }
 0x2ca   :  { %v2056_v29 = vpop.f32.mrf.mxu3 }
 0x2cb   :  { %2186 = vst [vmem:[#allocation4] sm:$0xff] %v2182_v28  ;;  %v2057_v10 = vadd.f32 %v2056_v29, %v2010_v15 }
 0x2d4   :  { %v2134_v13 = vpop.f32.mrf.mxu3 }
 0x2d5   :  { %v2162_v30 = vadd.f32 %v2134_v13, %v2057_v10 }
 0x2d7   :  { %v2172_v25 = vadd.f32 %v2166_v22, %v2162_v30 }
 0x2d9   :  { %v2184_v26 = vmax.f32 %v2172_v25, 0.0 }
 0x2db   :  { %2188 = vst [vmem:[#allocation4 + $0x10] sm:$0xff] %v2184_v26 }
 0x2dc   :  { %2215 = dma.vmem_to_hbm [thread:$0]  %s2208_s11, 512, %s2210_s26, [#allocation5], %s3137_s17, %s3137_s17, %s3138_s18  }
 0x2dd   :  { %2228 = dma.vmem_to_hbm [thread:$0]  %s2221_s0, 512, %s2223_s4, [#allocation5], %s3137_s17, %s3137_s17, %s3138_s18  }
 0x2de   :  { %3130 = dma.done.wait [#allocation3], 512  }
 0x2df   :  { %3131 = vsyncadd [#allocation3], 4294966784 }
 0x2e0   :  { %3132 = dma.done.wait [#allocation5], 1024  }
 0x2e1   :  { %3133 = vsyncadd [#allocation5], 4294966272 }
 0x2e2   :  { %3134 = dma.done.wait [#allocation8], 512  }
 0x2e3   :  { %3135 = vsyncadd [#allocation8], 4294966784 }
 0x2e4   :  { %2258 = vsyncpa [#allocation3], 1 }
 0x2e5   :  { %2259 = vsyncpa [#allocation5], 1 }
 0x2e6   :  { %2260 = vsyncpa [#allocation8], 1 }

</bundles_post_ra>
